<compile_context>
chip_gen: v7x
topology: tpu7x:2x2x1
jax: 0.10.0
libtpu: 0.0.40
codegen_flags: <defaults>
</compile_context>

<pallas_src>
import functools

import numpy as np
import jax
import jax.numpy as jnp
from jax.experimental import pallas as pl
from jax.experimental.pallas import tpu as pltpu

# Deterministic Sobel weights, identical to the PyTorch module's __init__.
_SOBEL_X = np.array(
    [[[-1, 0, 1], [-2, 0, 2], [-1, 0, 1]],
     [[-2, 0, 2], [-4, 0, 4], [-2, 0, 2]],
     [[-1, 0, 1], [-2, 0, 2], [-1, 0, 1]]], dtype=np.float32)
_SOBEL_Y = np.array(
    [[[-1, -2, -1], [0, 0, 0], [1, 2, 1]],
     [[-2, -4, -2], [0, 0, 0], [2, 4, 2]],
     [[-1, -2, -1], [0, 0, 0], [1, 2, 1]]], dtype=np.float32)
_SOBEL_Z = np.array(
    [[[1, 2, 1], [2, 4, 2], [1, 2, 1]],
     [[0, 0, 0], [0, 0, 0], [0, 0, 0]],
     [[-1, -2, -1], [-2, -4, -2], [-1, -2, -1]]], dtype=np.float32)


def _round_up(x, m):
    return ((x + m - 1) // m) * m


def _pick_d_tile(d, hw):
    """Largest multiple-of-8 divisor of D whose (TD, H*W) f32 block is <= ~2 MiB."""
    budget_rows = max(8, (2 * 1024 * 1024) // (4 * hw))
    if d <= budget_rows:
        return d
    cands = [t for t in range(8, d + 1, 8) if d % t == 0 and t <= budget_rows]
    if cands:
        return max(cands)
    return d  # fallback: single D block (block dims == array dims is always legal)


def _sobel_tile_kernel(m_ref, l_ref, mh_ref, lh_ref, out_ref, dpad_ref, *,
                       td, H, W, left, padl):
    """One (batch, D-tile): partial sum of |Gx(diff)| + |Gy(diff)| + |Gz(diff)|.

    m_ref/l_ref:   (td, H*W)   lane-flattened tile of moved / label.
    mh_ref/lh_ref: (2, H*W)    prev/next D halo rows (pre-zeroed if out of range).
    out_ref:       (8, 128)    per-tile partial sum, broadcast into the block.
    dpad_ref:      (td+16, padl) scratch slab: zero margins + diff rows.
    """
    hw = H * W
    f32 = jnp.float32
    r0 = 8  # first "center" row inside the slab (keeps the big store sublane-aligned)

    # ---- build the zero-margined diff slab: diff = moved - label (linearity) ----
    dpad_ref[0:r0, :] = jnp.zeros((r0, padl), f32)                       # top margin
    dpad_ref[r0 + td:r0 + td + 8, :] = jnp.zeros((8, padl), f32)         # bottom margin
    dpad_ref[r0:r0 + td, 0:left] = jnp.zeros((td, left), f32)            # left margin
    dpad_ref[r0:r0 + td, left + hw:padl] = jnp.zeros((td, padl - left - hw), f32)
    dpad_ref[r0:r0 + td, left:left + hw] = m_ref[...] - l_ref[...]       # center rows
    dpad_ref[r0 - 1:r0, left:left + hw] = mh_ref[0:1, :] - lh_ref[0:1, :]        # prev D row
    dpad_ref[r0 + td:r0 + td + 1, left:left + hw] = mh_ref[1:2, :] - lh_ref[1:2, :]  # next D row

    # ---- per-lane masks guarding taps that read w-1 / w+1 across flat-row wrap ----
    col = jax.lax.broadcasted_iota(jnp.int32, (1, hw), 1)
    wpos = col % W
    mask_lo = jnp.where(wpos >= 1, 1.0, 0.0).astype(f32)      # tap reads w-1
    mask_hi = jnp.where(wpos <= W - 2, 1.0, 0.0).astype(f32)  # tap reads w+1

    # ---- 26 nonzero taps: one shifted slice each, shared by the three filters ----
    gx = jnp.zeros((td, hw), f32)
    gy = jnp.zeros((td, hw), f32)
    gz = jnp.zeros((td, hw), f32)
    for kd in range(3):
        for kh in range(3):
            for kw in range(3):
                wx = float(_SOBEL_X[kd, kh, kw])
                wy = float(_SOBEL_Y[kd, kh, kw])
                wz = float(_SOBEL_Z[kd, kh, kw])
                if wx == 0.0 and wy == 0.0 and wz == 0.0:
                    continue  # only the exact center tap
                c0 = left + (kh - 1) * W + (kw - 1)
                s = dpad_ref[r0 - 1 + kd:r0 - 1 + kd + td, c0:c0 + hw]
                if kw == 0:
                    s = s * mask_lo
                elif kw == 2:
                    s = s * mask_hi
                if wx != 0.0:
                    gx = gx + wx * s
                if wy != 0.0:
                    gy = gy + wy * s
                if wz != 0.0:
                    gz = gz + wz * s

    # single reduction per tile (instead of 3 full-volume reductions)
    tot = jnp.abs(gx) + jnp.abs(gy) + jnp.abs(gz)
    out_ref[...] = jnp.broadcast_to(jnp.sum(tot), (8, 128))


def sobel_loss(moved, label, *, d_block_rows=None):
    """moved, label: (N, 1, D, H, W) float32 -> scalar float32 loss."""
    assert moved.shape == label.shape
    n, c, d, h, w = moved.shape
    assert c == 1, "Sobel kernels have a single input channel"
    hw = h * w

    m = moved.reshape(n, d, hw).astype(jnp.float32)
    l = label.reshape(n, d, hw).astype(jnp.float32)

    td = _pick_d_tile(d, hw) if d_block_rows is None else int(d_block_rows)
    assert d % td == 0, "D tile must divide D"
    ndb = d // td

    # Tiny halo side-arrays: prev/next D row per tile, pre-zeroed when out of range
    # (replaces the previous full-volume wrapper jnp.pad).
    starts = np.arange(ndb) * td
    prev_idx = np.clip(starts - 1, 0, d - 1)
    next_idx = np.clip(starts + td, 0, d - 1)
    prev_valid = (starts - 1 >= 0)[None, :, None]
    next_valid = (starts + td <= d - 1)[None, :, None]

    def _halo(x):
        p = jnp.where(prev_valid, x[:, prev_idx, :], 0.0)
        q = jnp.where(next_valid, x[:, next_idx, :], 0.0)
        return jnp.stack([p, q], axis=2)  # (n, ndb, 2, hw)

    m_halo = _halo(m)
    l_halo = _halo(l)

    left = _round_up(w + 1, 128)   # lane margins (>= W+1) so H-boundary reads hit zeros
    padl = left + hw + left
    count = n * c * d * h * w

    kernel = functools.partial(_sobel_tile_kernel,
                               td=td, H=h, W=w, left=left, padl=padl)

    partials = pl.pallas_call(
        kernel,
        out_shape=jax.ShapeDtypeStruct((n, ndb, 8, 128), jnp.float32),
        grid=(n, ndb),
        in_specs=[
            pl.BlockSpec((None, td, hw), lambda i, j: (i, j, 0)),          # moved tile
            pl.BlockSpec((None, td, hw), lambda i, j: (i, j, 0)),          # label tile
            pl.BlockSpec((None, None, 2, hw), lambda i, j: (i, j, 0, 0)),  # moved halo rows
            pl.BlockSpec((None, None, 2, hw), lambda i, j: (i, j, 0, 0)),  # label halo rows
        ],
        out_specs=pl.BlockSpec((None, None, 8, 128), lambda i, j: (i, j, 0, 0)),
        scratch_shapes=[pltpu.VMEM((td + 16, padl), jnp.float32)],
        compiler_params=pltpu.CompilerParams(
            dimension_semantics=("parallel", "parallel")),  # megacore-friendly on v7x
    )(m, l, m_halo, l_halo)

    # Per-tile partials -> final mean; same normalization as 3x F.l1_loss / 3.
    return partials[:, :, 0, 0].sum() / (jnp.float32(count) * 3.0)


def _reference_loss(moved, label):
    """Pure-JAX reference that mirrors the PyTorch conv3d + l1_loss semantics."""
    m = moved[:, 0].astype(jnp.float32)
    l = label[:, 0].astype(jnp.float32)
    diff = m - l                                  # linearity of conv
    n_, d_, h_, w_ = m.shape
    dpad = jnp.pad(diff, ((0, 0), (1, 1), (1, 1), (1, 1)))
    gx = jnp.zeros_like(m)
    gy = jnp.zeros_like(m)
    gz = jnp.zeros_like(m)
    for kd in range(3):
        for kh in range(3):
            for kw in range(3):
                sl = dpad[:, kd:kd + d_, kh:kh + h_, kw:kw + w_]
                gx = gx + float(_SOBEL_X[kd, kh, kw]) * sl
                gy = gy + float(_SOBEL_Y[kd, kh, kw]) * sl
                gz = gz + float(_SOBEL_Z[kd, kh, kw]) * sl
    return (jnp.mean(jnp.abs(gx)) + jnp.mean(jnp.abs(gy)) + jnp.mean(jnp.abs(gz))) / 3.0


if __name__ == "__main__":
    key = jax.random.PRNGKey(0)
    k_m, k_l = jax.random.split(key)
    shape = (2, 1, 16, 16, 16)  # (N, C, D, H, W)
    moved = jax.random.normal(k_m, shape, dtype=jnp.float32)
    label = jax.random.normal(k_l, shape, dtype=jnp.float32)

    # d_block_rows=8 -> grid (2, 2): exercises the tiled path with D halos + megacore.
    loss = jax.jit(functools.partial(sobel_loss, d_block_rows=8))(moved, label)
    loss = jax.block_until_ready(loss)

    ref = jax.block_until_ready(_reference_loss(moved, label))
    assert jnp.isfinite(loss)
    assert abs(float(loss) - float(ref)) <= 1e-4 + 1e-4 * abs(float(ref)), (float(loss), float(ref))
    print("KERNEL_OK")
</pallas_src>

<mosaic_0001>
module attributes {stable_mosaic.version = 11 : i64} {
  func.func @_sobel_tile_kernel(%arg0: i32, %arg1: i32, %arg2: memref<1x8x256xf32, #tpu.memory_space<vmem>>, %arg3: memref<1x8x256xf32, #tpu.memory_space<vmem>>, %arg4: memref<1x1x2x256xf32, #tpu.memory_space<vmem>>, %arg5: memref<1x1x2x256xf32, #tpu.memory_space<vmem>>, %arg6: memref<1x1x8x128xf32, #tpu.memory_space<vmem>>, %arg7: memref<24x512xf32, #tpu.memory_space<vmem>>) attributes {dimension_semantics = [#tpu.dimension_semantics<parallel>, #tpu.dimension_semantics<parallel>], iteration_bounds = array<i64: 2, 2>, scalar_prefetch = 0 : i64, scratch_operands = 1 : i64, tpu.core_type = #tpu.core_type<tc>, window_params = [{transform_indices = @transform_0, window_bounds = array<i64: 1, 8, 256>}, {transform_indices = @transform_1, window_bounds = array<i64: 1, 8, 256>}, {transform_indices = @transform_2, window_bounds = array<i64: 1, 1, 2, 256>}, {transform_indices = @transform_3, window_bounds = array<i64: 1, 1, 2, 256>}, {transform_indices = @transform_4, window_bounds = array<i64: 1, 1, 8, 128>}]} {
    %cst = arith.constant 0.000000e+00 : f32
    %0 = vector.broadcast %cst : f32 to vector<8x512xf32>
    %c0 = arith.constant 0 : index
    %c0_0 = arith.constant 0 : index
    %1 = vector.load %arg7[%c0, %c0_0] : memref<24x512xf32, #tpu.memory_space<vmem>>, vector<8x512xf32>
    tpu.vector_store %arg7[%c0, %c0_0], %0 {strides = array<i32>} : memref<24x512xf32, #tpu.memory_space<vmem>>, vector<8x512xf32>,
    %cst_1 = arith.constant 0.000000e+00 : f32
    %2 = vector.broadcast %cst_1 : f32 to vector<8x512xf32>
    %c16 = arith.constant 16 : index
    %c0_2 = arith.constant 0 : index
    %3 = vector.load %arg7[%c16, %c0_2] : memref<24x512xf32, #tpu.memory_space<vmem>>, vector<8x512xf32>
    tpu.vector_store %arg7[%c16, %c0_2], %2 {strides = array<i32>} : memref<24x512xf32, #tpu.memory_space<vmem>>, vector<8x512xf32>,
    %cst_3 = arith.constant 0.000000e+00 : f32
    %4 = vector.broadcast %cst_3 : f32 to vector<8x128xf32>
    %c8 = arith.constant 8 : index
    %c0_4 = arith.constant 0 : index
    %5 = vector.load %arg7[%c8, %c0_4] : memref<24x512xf32, #tpu.memory_space<vmem>>, vector<8x128xf32>
    tpu.vector_store %arg7[%c8, %c0_4], %4 {strides = array<i32>} : memref<24x512xf32, #tpu.memory_space<vmem>>, vector<8x128xf32>,
    %cst_5 = arith.constant 0.000000e+00 : f32
    %6 = vector.broadcast %cst_5 : f32 to vector<8x128xf32>
    %c8_6 = arith.constant 8 : index
    %c384 = arith.constant 384 : index
    %7 = vector.load %arg7[%c8_6, %c384] : memref<24x512xf32, #tpu.memory_space<vmem>>, vector<8x128xf32>
    tpu.vector_store %arg7[%c8_6, %c384], %6 {strides = array<i32>} : memref<24x512xf32, #tpu.memory_space<vmem>>, vector<8x128xf32>,
    %c0_7 = arith.constant 0 : index
    %c0_8 = arith.constant 0 : index
    %c0_9 = arith.constant 0 : index
    %8 = vector.load %arg2[%c0_7, %c0_8, %c0_9] : memref<1x8x256xf32, #tpu.memory_space<vmem>>, vector<1x8x256xf32>
    %9 = vector.shape_cast %8 : vector<1x8x256xf32> to vector<8x256xf32>
    %c0_10 = arith.constant 0 : index
    %c0_11 = arith.constant 0 : index
    %c0_12 = arith.constant 0 : index
    %10 = vector.load %arg3[%c0_10, %c0_11, %c0_12] : memref<1x8x256xf32, #tpu.memory_space<vmem>>, vector<1x8x256xf32>
    %11 = vector.shape_cast %10 : vector<1x8x256xf32> to vector<8x256xf32>
    %12 = arith.subf %9, %11 : vector<8x256xf32>
    %c8_13 = arith.constant 8 : index
    %c128 = arith.constant 128 : index
    %13 = vector.load %arg7[%c8_13, %c128] : memref<24x512xf32, #tpu.memory_space<vmem>>, vector<8x256xf32>
    tpu.vector_store %arg7[%c8_13, %c128], %12 {strides = array<i32>} : memref<24x512xf32, #tpu.memory_space<vmem>>, vector<8x256xf32>,
    %c0_14 = arith.constant 0 : index
    %c0_15 = arith.constant 0 : index
    %c0_16 = arith.constant 0 : index
    %c0_17 = arith.constant 0 : index
    %14 = vector.load %arg4[%c0_14, %c0_15, %c0_16, %c0_17] : memref<1x1x2x256xf32, #tpu.memory_space<vmem>>, vector<1x1x1x256xf32>
    %15 = vector.shape_cast %14 : vector<1x1x1x256xf32> to vector<1x256xf32>
    %c0_18 = arith.constant 0 : index
    %c0_19 = arith.constant 0 : index
    %c0_20 = arith.constant 0 : index
    %c0_21 = arith.constant 0 : index
    %16 = vector.load %arg5[%c0_18, %c0_19, %c0_20, %c0_21] : memref<1x1x2x256xf32, #tpu.memory_space<vmem>>, vector<1x1x1x256xf32>
    %17 = vector.shape_cast %16 : vector<1x1x1x256xf32> to vector<1x256xf32>
    %18 = arith.subf %15, %17 : vector<1x256xf32>
    %c7 = arith.constant 7 : index
    %c128_22 = arith.constant 128 : index
    %19 = vector.load %arg7[%c7, %c128_22] : memref<24x512xf32, #tpu.memory_space<vmem>>, vector<1x256xf32>
    tpu.vector_store %arg7[%c7, %c128_22], %18 {strides = array<i32>} : memref<24x512xf32, #tpu.memory_space<vmem>>, vector<1x256xf32>,
    %c0_23 = arith.constant 0 : index
    %c0_24 = arith.constant 0 : index
    %c1 = arith.constant 1 : index
    %c0_25 = arith.constant 0 : index
    %20 = vector.load %arg4[%c0_23, %c0_24, %c1, %c0_25] : memref<1x1x2x256xf32, #tpu.memory_space<vmem>>, vector<1x1x1x256xf32>
    %21 = vector.shape_cast %20 : vector<1x1x1x256xf32> to vector<1x256xf32>
    %c0_26 = arith.constant 0 : index
    %c0_27 = arith.constant 0 : index
    %c1_28 = arith.constant 1 : index
    %c0_29 = arith.constant 0 : index
    %22 = vector.load %arg5[%c0_26, %c0_27, %c1_28, %c0_29] : memref<1x1x2x256xf32, #tpu.memory_space<vmem>>, vector<1x1x1x256xf32>
    %23 = vector.shape_cast %22 : vector<1x1x1x256xf32> to vector<1x256xf32>
    %24 = arith.subf %21, %23 : vector<1x256xf32>
    %c16_30 = arith.constant 16 : index
    %c128_31 = arith.constant 128 : index
    %25 = vector.load %arg7[%c16_30, %c128_31] : memref<24x512xf32, #tpu.memory_space<vmem>>, vector<1x256xf32>
    tpu.vector_store %arg7[%c16_30, %c128_31], %24 {strides = array<i32>} : memref<24x512xf32, #tpu.memory_space<vmem>>, vector<1x256xf32>,
    %26 = tpu.iota {dimensions = array<i32: 1>} : vector<1x256xi32>
    %c16_i32 = arith.constant 16 : i32
    %c0_i32 = arith.constant 0 : i32
    %27 = arith.cmpi eq, %c16_i32, %c0_i32 : i32
    %c1_i32 = arith.constant 1 : i32
    %28 = arith.select %27, %c1_i32, %c16_i32 : i32
    %29 = vector.broadcast %28 : i32 to vector<1x256xi32>
    %30 = arith.remsi %26, %29 : vector<1x256xi32>
    %c0_i32_32 = arith.constant 0 : i32
    %31 = vector.broadcast %c0_i32_32 : i32 to vector<1x256xi32>
    %32 = arith.cmpi ne, %30, %31 : vector<1x256xi32>
    %c0_i32_33 = arith.constant 0 : i32
    %33 = vector.broadcast %c0_i32_33 : i32 to vector<1x256xi32>
    %34 = arith.cmpi slt, %30, %33 : vector<1x256xi32>
    %c0_i32_34 = arith.constant 0 : i32
    %35 = arith.cmpi slt, %28, %c0_i32_34 : i32
    %36 = vector.broadcast %35 : i1 to vector<1x256xi1>
    %37 = vector.broadcast %36 : vector<1x256xi1> to vector<1x256xi1>
    %38 = arith.xori %34, %37 : vector<1x256xi1>
    %39 = arith.andi %38, %32 : vector<1x256xi1>
    %40 = vector.broadcast %28 : i32 to vector<1x256xi32>
    %41 = arith.addi %30, %40 : vector<1x256xi32>
    %42 = arith.select %39, %41, %30 : vector<1x256xi1>, vector<1x256xi32>
    %c1_i32_35 = arith.constant 1 : i32
    %43 = vector.broadcast %c1_i32_35 : i32 to vector<1x256xi32>
    %44 = arith.cmpi sge, %42, %43 : vector<1x256xi32>
    %cst_36 = arith.constant 1.000000e+00 : f32
    %cst_37 = arith.constant 0.000000e+00 : f32
    %45 = vector.broadcast %cst_36 : f32 to vector<1x256xf32>
    %46 = vector.broadcast %cst_37 : f32 to vector<1x256xf32>
    %47 = arith.select %44, %45, %46 : vector<1x256xi1>, vector<1x256xf32>
    %c14_i32 = arith.constant 14 : i32
    %48 = vector.broadcast %c14_i32 : i32 to vector<1x256xi32>
    %49 = arith.cmpi sle, %42, %48 : vector<1x256xi32>
    %cst_38 = arith.constant 1.000000e+00 : f32
    %cst_39 = arith.constant 0.000000e+00 : f32
    %50 = vector.broadcast %cst_38 : f32 to vector<1x256xf32>
    %51 = vector.broadcast %cst_39 : f32 to vector<1x256xf32>
    %52 = arith.select %49, %50, %51 : vector<1x256xi1>, vector<1x256xf32>
    %cst_40 = arith.constant 0.000000e+00 : f32
    %53 = vector.broadcast %cst_40 : f32 to vector<8x256xf32>
    %cst_41 = arith.constant 0.000000e+00 : f32
    %54 = vector.broadcast %cst_41 : f32 to vector<8x256xf32>
    %cst_42 = arith.constant 0.000000e+00 : f32
    %55 = vector.broadcast %cst_42 : f32 to vector<8x256xf32>
    %c7_43 = arith.constant 7 : index
    %c111 = arith.constant 111 : index
    %56 = vector.load %arg7[%c7_43, %c111] : memref<24x512xf32, #tpu.memory_space<vmem>>, vector<8x256xf32>
    %57 = vector.broadcast %47 : vector<1x256xf32> to vector<8x256xf32>
    %58 = arith.mulf %56, %57 : vector<8x256xf32>
    %cst_44 = arith.constant -1.000000e+00 : f32
    %59 = vector.broadcast %cst_44 : f32 to vector<8x256xf32>
    %60 = arith.mulf %59, %58 : vector<8x256xf32>
    %61 = arith.addf %53, %60 : vector<8x256xf32>
    %cst_45 = arith.constant -1.000000e+00 : f32
    %62 = vector.broadcast %cst_45 : f32 to vector<8x256xf32>
    %63 = arith.mulf %62, %58 : vector<8x256xf32>
    %64 = arith.addf %54, %63 : vector<8x256xf32>
    %cst_46 = arith.constant 1.000000e+00 : f32
    %65 = vector.broadcast %cst_46 : f32 to vector<8x256xf32>
    %66 = arith.mulf %65, %58 : vector<8x256xf32>
    %67 = arith.addf %55, %66 : vector<8x256xf32>
    %c7_47 = arith.constant 7 : index
    %c112 = arith.constant 112 : index
    %68 = vector.load %arg7[%c7_47, %c112] : memref<24x512xf32, #tpu.memory_space<vmem>>, vector<8x256xf32>
    %cst_48 = arith.constant -2.000000e+00 : f32
    %69 = vector.broadcast %cst_48 : f32 to vector<8x256xf32>
    %70 = arith.mulf %69, %68 : vector<8x256xf32>
    %71 = arith.addf %64, %70 : vector<8x256xf32>
    %cst_49 = arith.constant 2.000000e+00 : f32
    %72 = vector.broadcast %cst_49 : f32 to vector<8x256xf32>
    %73 = arith.mulf %72, %68 : vector<8x256xf32>
    %74 = arith.addf %67, %73 : vector<8x256xf32>
    %c7_50 = arith.constant 7 : index
    %c113 = arith.constant 113 : index
    %75 = vector.load %arg7[%c7_50, %c113] : memref<24x512xf32, #tpu.memory_space<vmem>>, vector<8x256xf32>
    %76 = vector.broadcast %52 : vector<1x256xf32> to vector<8x256xf32>
    %77 = arith.mulf %75, %76 : vector<8x256xf32>
    %cst_51 = arith.constant 1.000000e+00 : f32
    %78 = vector.broadcast %cst_51 : f32 to vector<8x256xf32>
    %79 = arith.mulf %78, %77 : vector<8x256xf32>
    %80 = arith.addf %61, %79 : vector<8x256xf32>
    %cst_52 = arith.constant -1.000000e+00 : f32
    %81 = vector.broadcast %cst_52 : f32 to vector<8x256xf32>
    %82 = arith.mulf %81, %77 : vector<8x256xf32>
    %83 = arith.addf %71, %82 : vector<8x256xf32>
    %cst_53 = arith.constant 1.000000e+00 : f32
    %84 = vector.broadcast %cst_53 : f32 to vector<8x256xf32>
    %85 = arith.mulf %84, %77 : vector<8x256xf32>
    %86 = arith.addf %74, %85 : vector<8x256xf32>
    %c7_54 = arith.constant 7 : index
    %c127 = arith.constant 127 : index
    %87 = vector.load %arg7[%c7_54, %c127] : memref<24x512xf32, #tpu.memory_space<vmem>>, vector<8x256xf32>
    %88 = vector.broadcast %47 : vector<1x256xf32> to vector<8x256xf32>
    %89 = arith.mulf %87, %88 : vector<8x256xf32>
    %cst_55 = arith.constant -2.000000e+00 : f32
    %90 = vector.broadcast %cst_55 : f32 to vector<8x256xf32>
    %91 = arith.mulf %90, %89 : vector<8x256xf32>
    %92 = arith.addf %80, %91 : vector<8x256xf32>
    %cst_56 = arith.constant 2.000000e+00 : f32
    %93 = vector.broadcast %cst_56 : f32 to vector<8x256xf32>
    %94 = arith.mulf %93, %89 : vector<8x256xf32>
    %95 = arith.addf %86, %94 : vector<8x256xf32>
    %c7_57 = arith.constant 7 : index
    %c128_58 = arith.constant 128 : index
    %96 = vector.load %arg7[%c7_57, %c128_58] : memref<24x512xf32, #tpu.memory_space<vmem>>, vector<8x256xf32>
    %cst_59 = arith.constant 4.000000e+00 : f32
    %97 = vector.broadcast %cst_59 : f32 to vector<8x256xf32>
    %98 = arith.mulf %97, %96 : vector<8x256xf32>
    %99 = arith.addf %95, %98 : vector<8x256xf32>
    %c7_60 = arith.constant 7 : index
    %c129 = arith.constant 129 : index
    %100 = vector.load %arg7[%c7_60, %c129] : memref<24x512xf32, #tpu.memory_space<vmem>>, vector<8x256xf32>
    %101 = vector.broadcast %52 : vector<1x256xf32> to vector<8x256xf32>
    %102 = arith.mulf %100, %101 : vector<8x256xf32>
    %cst_61 = arith.constant 2.000000e+00 : f32
    %103 = vector.broadcast %cst_61 : f32 to vector<8x256xf32>
    %104 = arith.mulf %103, %102 : vector<8x256xf32>
    %105 = arith.addf %92, %104 : vector<8x256xf32>
    %cst_62 = arith.constant 2.000000e+00 : f32
    %106 = vector.broadcast %cst_62 : f32 to vector<8x256xf32>
    %107 = arith.mulf %106, %102 : vector<8x256xf32>
    %108 = arith.addf %99, %107 : vector<8x256xf32>
    %c7_63 = arith.constant 7 : index
    %c143 = arith.constant 143 : index
    %109 = vector.load %arg7[%c7_63, %c143] : memref<24x512xf32, #tpu.memory_space<vmem>>, vector<8x256xf32>
    %110 = vector.broadcast %47 : vector<1x256xf32> to vector<8x256xf32>
    %111 = arith.mulf %109, %110 : vector<8x256xf32>
    %cst_64 = arith.constant -1.000000e+00 : f32
    %112 = vector.broadcast %cst_64 : f32 to vector<8x256xf32>
    %113 = arith.mulf %112, %111 : vector<8x256xf32>
    %114 = arith.addf %105, %113 : vector<8x256xf32>
    %cst_65 = arith.constant 1.000000e+00 : f32
    %115 = vector.broadcast %cst_65 : f32 to vector<8x256xf32>
    %116 = arith.mulf %115, %111 : vector<8x256xf32>
    %117 = arith.addf %83, %116 : vector<8x256xf32>
    %cst_66 = arith.constant 1.000000e+00 : f32
    %118 = vector.broadcast %cst_66 : f32 to vector<8x256xf32>
    %119 = arith.mulf %118, %111 : vector<8x256xf32>
    %120 = arith.addf %108, %119 : vector<8x256xf32>
    %c7_67 = arith.constant 7 : index
    %c144 = arith.constant 144 : index
    %121 = vector.load %arg7[%c7_67, %c144] : memref<24x512xf32, #tpu.memory_space<vmem>>, vector<8x256xf32>
    %cst_68 = arith.constant 2.000000e+00 : f32
    %122 = vector.broadcast %cst_68 : f32 to vector<8x256xf32>
    %123 = arith.mulf %122, %121 : vector<8x256xf32>
    %124 = arith.addf %117, %123 : vector<8x256xf32>
    %cst_69 = arith.constant 2.000000e+00 : f32
    %125 = vector.broadcast %cst_69 : f32 to vector<8x256xf32>
    %126 = arith.mulf %125, %121 : vector<8x256xf32>
    %127 = arith.addf %120, %126 : vector<8x256xf32>
    %c7_70 = arith.constant 7 : index
    %c145 = arith.constant 145 : index
    %128 = vector.load %arg7[%c7_70, %c145] : memref<24x512xf32, #tpu.memory_space<vmem>>, vector<8x256xf32>
    %129 = vector.broadcast %52 : vector<1x256xf32> to vector<8x256xf32>
    %130 = arith.mulf %128, %129 : vector<8x256xf32>
    %cst_71 = arith.constant 1.000000e+00 : f32
    %131 = vector.broadcast %cst_71 : f32 to vector<8x256xf32>
    %132 = arith.mulf %131, %130 : vector<8x256xf32>
    %133 = arith.addf %114, %132 : vector<8x256xf32>
    %cst_72 = arith.constant 1.000000e+00 : f32
    %134 = vector.broadcast %cst_72 : f32 to vector<8x256xf32>
    %135 = arith.mulf %134, %130 : vector<8x256xf32>
    %136 = arith.addf %124, %135 : vector<8x256xf32>
    %cst_73 = arith.constant 1.000000e+00 : f32
    %137 = vector.broadcast %cst_73 : f32 to vector<8x256xf32>
    %138 = arith.mulf %137, %130 : vector<8x256xf32>
    %139 = arith.addf %127, %138 : vector<8x256xf32>
    %c8_74 = arith.constant 8 : index
    %c111_75 = arith.constant 111 : index
    %140 = vector.load %arg7[%c8_74, %c111_75] : memref<24x512xf32, #tpu.memory_space<vmem>>, vector<8x256xf32>
    %141 = vector.broadcast %47 : vector<1x256xf32> to vector<8x256xf32>
    %142 = arith.mulf %140, %141 : vector<8x256xf32>
    %cst_76 = arith.constant -2.000000e+00 : f32
    %143 = vector.broadcast %cst_76 : f32 to vector<8x256xf32>
    %144 = arith.mulf %143, %142 : vector<8x256xf32>
    %145 = arith.addf %133, %144 : vector<8x256xf32>
    %cst_77 = arith.constant -2.000000e+00 : f32
    %146 = vector.broadcast %cst_77 : f32 to vector<8x256xf32>
    %147 = arith.mulf %146, %142 : vector<8x256xf32>
    %148 = arith.addf %136, %147 : vector<8x256xf32>
    %c8_78 = arith.constant 8 : index
    %c112_79 = arith.constant 112 : index
    %149 = vector.load %arg7[%c8_78, %c112_79] : memref<24x512xf32, #tpu.memory_space<vmem>>, vector<8x256xf32>
    %cst_80 = arith.constant -4.000000e+00 : f32
    %150 = vector.broadcast %cst_80 : f32 to vector<8x256xf32>
    %151 = arith.mulf %150, %149 : vector<8x256xf32>
    %152 = arith.addf %148, %151 : vector<8x256xf32>
    %c8_81 = arith.constant 8 : index
    %c113_82 = arith.constant 113 : index
    %153 = vector.load %arg7[%c8_81, %c113_82] : memref<24x512xf32, #tpu.memory_space<vmem>>, vector<8x256xf32>
    %154 = vector.broadcast %52 : vector<1x256xf32> to vector<8x256xf32>
    %155 = arith.mulf %153, %154 : vector<8x256xf32>
    %cst_83 = arith.constant 2.000000e+00 : f32
    %156 = vector.broadcast %cst_83 : f32 to vector<8x256xf32>
    %157 = arith.mulf %156, %155 : vector<8x256xf32>
    %158 = arith.addf %145, %157 : vector<8x256xf32>
    %cst_84 = arith.constant -2.000000e+00 : f32
    %159 = vector.broadcast %cst_84 : f32 to vector<8x256xf32>
    %160 = arith.mulf %159, %155 : vector<8x256xf32>
    %161 = arith.addf %152, %160 : vector<8x256xf32>
    %c8_85 = arith.constant 8 : index
    %c127_86 = arith.constant 127 : index
    %162 = vector.load %arg7[%c8_85, %c127_86] : memref<24x512xf32, #tpu.memory_space<vmem>>, vector<8x256xf32>
    %163 = vector.broadcast %47 : vector<1x256xf32> to vector<8x256xf32>
    %164 = arith.mulf %162, %163 : vector<8x256xf32>
    %cst_87 = arith.constant -4.000000e+00 : f32
    %165 = vector.broadcast %cst_87 : f32 to vector<8x256xf32>
    %166 = arith.mulf %165, %164 : vector<8x256xf32>
    %167 = arith.addf %158, %166 : vector<8x256xf32>
    %c8_88 = arith.constant 8 : index
    %c129_89 = arith.constant 129 : index
    %168 = vector.load %arg7[%c8_88, %c129_89] : memref<24x512xf32, #tpu.memory_space<vmem>>, vector<8x256xf32>
    %169 = vector.broadcast %52 : vector<1x256xf32> to vector<8x256xf32>
    %170 = arith.mulf %168, %169 : vector<8x256xf32>
    %cst_90 = arith.constant 4.000000e+00 : f32
    %171 = vector.broadcast %cst_90 : f32 to vector<8x256xf32>
    %172 = arith.mulf %171, %170 : vector<8x256xf32>
    %173 = arith.addf %167, %172 : vector<8x256xf32>
    %c8_91 = arith.constant 8 : index
    %c143_92 = arith.constant 143 : index
    %174 = vector.load %arg7[%c8_91, %c143_92] : memref<24x512xf32, #tpu.memory_space<vmem>>, vector<8x256xf32>
    %175 = vector.broadcast %47 : vector<1x256xf32> to vector<8x256xf32>
    %176 = arith.mulf %174, %175 : vector<8x256xf32>
    %cst_93 = arith.constant -2.000000e+00 : f32
    %177 = vector.broadcast %cst_93 : f32 to vector<8x256xf32>
    %178 = arith.mulf %177, %176 : vector<8x256xf32>
    %179 = arith.addf %173, %178 : vector<8x256xf32>
    %cst_94 = arith.constant 2.000000e+00 : f32
    %180 = vector.broadcast %cst_94 : f32 to vector<8x256xf32>
    %181 = arith.mulf %180, %176 : vector<8x256xf32>
    %182 = arith.addf %161, %181 : vector<8x256xf32>
    %c8_95 = arith.constant 8 : index
    %c144_96 = arith.constant 144 : index
    %183 = vector.load %arg7[%c8_95, %c144_96] : memref<24x512xf32, #tpu.memory_space<vmem>>, vector<8x256xf32>
    %cst_97 = arith.constant 4.000000e+00 : f32
    %184 = vector.broadcast %cst_97 : f32 to vector<8x256xf32>
    %185 = arith.mulf %184, %183 : vector<8x256xf32>
    %186 = arith.addf %182, %185 : vector<8x256xf32>
    %c8_98 = arith.constant 8 : index
    %c145_99 = arith.constant 145 : index
    %187 = vector.load %arg7[%c8_98, %c145_99] : memref<24x512xf32, #tpu.memory_space<vmem>>, vector<8x256xf32>
    %188 = vector.broadcast %52 : vector<1x256xf32> to vector<8x256xf32>
    %189 = arith.mulf %187, %188 : vector<8x256xf32>
    %cst_100 = arith.constant 2.000000e+00 : f32
    %190 = vector.broadcast %cst_100 : f32 to vector<8x256xf32>
    %191 = arith.mulf %190, %189 : vector<8x256xf32>
    %192 = arith.addf %179, %191 : vector<8x256xf32>
    %cst_101 = arith.constant 2.000000e+00 : f32
    %193 = vector.broadcast %cst_101 : f32 to vector<8x256xf32>
    %194 = arith.mulf %193, %189 : vector<8x256xf32>
    %195 = arith.addf %186, %194 : vector<8x256xf32>
    %c9 = arith.constant 9 : index
    %c111_102 = arith.constant 111 : index
    %196 = vector.load %arg7[%c9, %c111_102] : memref<24x512xf32, #tpu.memory_space<vmem>>, vector<8x256xf32>
    %197 = vector.broadcast %47 : vector<1x256xf32> to vector<8x256xf32>
    %198 = arith.mulf %196, %197 : vector<8x256xf32>
    %cst_103 = arith.constant -1.000000e+00 : f32
    %199 = vector.broadcast %cst_103 : f32 to vector<8x256xf32>
    %200 = arith.mulf %199, %198 : vector<8x256xf32>
    %201 = arith.addf %192, %200 : vector<8x256xf32>
    %cst_104 = arith.constant -1.000000e+00 : f32
    %202 = vector.broadcast %cst_104 : f32 to vector<8x256xf32>
    %203 = arith.mulf %202, %198 : vector<8x256xf32>
    %204 = arith.addf %195, %203 : vector<8x256xf32>
    %cst_105 = arith.constant -1.000000e+00 : f32
    %205 = vector.broadcast %cst_105 : f32 to vector<8x256xf32>
    %206 = arith.mulf %205, %198 : vector<8x256xf32>
    %207 = arith.addf %139, %206 : vector<8x256xf32>
    %c9_106 = arith.constant 9 : index
    %c112_107 = arith.constant 112 : index
    %208 = vector.load %arg7[%c9_106, %c112_107] : memref<24x512xf32, #tpu.memory_space<vmem>>, vector<8x256xf32>
    %cst_108 = arith.constant -2.000000e+00 : f32
    %209 = vector.broadcast %cst_108 : f32 to vector<8x256xf32>
    %210 = arith.mulf %209, %208 : vector<8x256xf32>
    %211 = arith.addf %204, %210 : vector<8x256xf32>
    %cst_109 = arith.constant -2.000000e+00 : f32
    %212 = vector.broadcast %cst_109 : f32 to vector<8x256xf32>
    %213 = arith.mulf %212, %208 : vector<8x256xf32>
    %214 = arith.addf %207, %213 : vector<8x256xf32>
    %c9_110 = arith.constant 9 : index
    %c113_111 = arith.constant 113 : index
    %215 = vector.load %arg7[%c9_110, %c113_111] : memref<24x512xf32, #tpu.memory_space<vmem>>, vector<8x256xf32>
    %216 = vector.broadcast %52 : vector<1x256xf32> to vector<8x256xf32>
    %217 = arith.mulf %215, %216 : vector<8x256xf32>
    %cst_112 = arith.constant 1.000000e+00 : f32
    %218 = vector.broadcast %cst_112 : f32 to vector<8x256xf32>
    %219 = arith.mulf %218, %217 : vector<8x256xf32>
    %220 = arith.addf %201, %219 : vector<8x256xf32>
    %cst_113 = arith.constant -1.000000e+00 : f32
    %221 = vector.broadcast %cst_113 : f32 to vector<8x256xf32>
    %222 = arith.mulf %221, %217 : vector<8x256xf32>
    %223 = arith.addf %211, %222 : vector<8x256xf32>
    %cst_114 = arith.constant -1.000000e+00 : f32
    %224 = vector.broadcast %cst_114 : f32 to vector<8x256xf32>
    %225 = arith.mulf %224, %217 : vector<8x256xf32>
    %226 = arith.addf %214, %225 : vector<8x256xf32>
    %c9_115 = arith.constant 9 : index
    %c127_116 = arith.constant 127 : index
    %227 = vector.load %arg7[%c9_115, %c127_116] : memref<24x512xf32, #tpu.memory_space<vmem>>, vector<8x256xf32>
    %228 = vector.broadcast %47 : vector<1x256xf32> to vector<8x256xf32>
    %229 = arith.mulf %227, %228 : vector<8x256xf32>
    %cst_117 = arith.constant -2.000000e+00 : f32
    %230 = vector.broadcast %cst_117 : f32 to vector<8x256xf32>
    %231 = arith.mulf %230, %229 : vector<8x256xf32>
    %232 = arith.addf %220, %231 : vector<8x256xf32>
    %cst_118 = arith.constant -2.000000e+00 : f32
    %233 = vector.broadcast %cst_118 : f32 to vector<8x256xf32>
    %234 = arith.mulf %233, %229 : vector<8x256xf32>
    %235 = arith.addf %226, %234 : vector<8x256xf32>
    %c9_119 = arith.constant 9 : index
    %c128_120 = arith.constant 128 : index
    %236 = vector.load %arg7[%c9_119, %c128_120] : memref<24x512xf32, #tpu.memory_space<vmem>>, vector<8x256xf32>
    %cst_121 = arith.constant -4.000000e+00 : f32
    %237 = vector.broadcast %cst_121 : f32 to vector<8x256xf32>
    %238 = arith.mulf %237, %236 : vector<8x256xf32>
    %239 = arith.addf %235, %238 : vector<8x256xf32>
    %c9_122 = arith.constant 9 : index
    %c129_123 = arith.constant 129 : index
    %240 = vector.load %arg7[%c9_122, %c129_123] : memref<24x512xf32, #tpu.memory_space<vmem>>, vector<8x256xf32>
    %241 = vector.broadcast %52 : vector<1x256xf32> to vector<8x256xf32>
    %242 = arith.mulf %240, %241 : vector<8x256xf32>
    %cst_124 = arith.constant 2.000000e+00 : f32
    %243 = vector.broadcast %cst_124 : f32 to vector<8x256xf32>
    %244 = arith.mulf %243, %242 : vector<8x256xf32>
    %245 = arith.addf %232, %244 : vector<8x256xf32>
    %cst_125 = arith.constant -2.000000e+00 : f32
    %246 = vector.broadcast %cst_125 : f32 to vector<8x256xf32>
    %247 = arith.mulf %246, %242 : vector<8x256xf32>
    %248 = arith.addf %239, %247 : vector<8x256xf32>
    %c9_126 = arith.constant 9 : index
    %c143_127 = arith.constant 143 : index
    %249 = vector.load %arg7[%c9_126, %c143_127] : memref<24x512xf32, #tpu.memory_space<vmem>>, vector<8x256xf32>
    %250 = vector.broadcast %47 : vector<1x256xf32> to vector<8x256xf32>
    %251 = arith.mulf %249, %250 : vector<8x256xf32>
    %cst_128 = arith.constant -1.000000e+00 : f32
    %252 = vector.broadcast %cst_128 : f32 to vector<8x256xf32>
    %253 = arith.mulf %252, %251 : vector<8x256xf32>
    %254 = arith.addf %245, %253 : vector<8x256xf32>
    %cst_129 = arith.constant 1.000000e+00 : f32
    %255 = vector.broadcast %cst_129 : f32 to vector<8x256xf32>
    %256 = arith.mulf %255, %251 : vector<8x256xf32>
    %257 = arith.addf %223, %256 : vector<8x256xf32>
    %cst_130 = arith.constant -1.000000e+00 : f32
    %258 = vector.broadcast %cst_130 : f32 to vector<8x256xf32>
    %259 = arith.mulf %258, %251 : vector<8x256xf32>
    %260 = arith.addf %248, %259 : vector<8x256xf32>
    %c9_131 = arith.constant 9 : index
    %c144_132 = arith.constant 144 : index
    %261 = vector.load %arg7[%c9_131, %c144_132] : memref<24x512xf32, #tpu.memory_space<vmem>>, vector<8x256xf32>
    %cst_133 = arith.constant 2.000000e+00 : f32
    %262 = vector.broadcast %cst_133 : f32 to vector<8x256xf32>
    %263 = arith.mulf %262, %261 : vector<8x256xf32>
    %264 = arith.addf %257, %263 : vector<8x256xf32>
    %cst_134 = arith.constant -2.000000e+00 : f32
    %265 = vector.broadcast %cst_134 : f32 to vector<8x256xf32>
    %266 = arith.mulf %265, %261 : vector<8x256xf32>
    %267 = arith.addf %260, %266 : vector<8x256xf32>
    %c9_135 = arith.constant 9 : index
    %c145_136 = arith.constant 145 : index
    %268 = vector.load %arg7[%c9_135, %c145_136] : memref<24x512xf32, #tpu.memory_space<vmem>>, vector<8x256xf32>
    %269 = vector.broadcast %52 : vector<1x256xf32> to vector<8x256xf32>
    %270 = arith.mulf %268, %269 : vector<8x256xf32>
    %cst_137 = arith.constant 1.000000e+00 : f32
    %271 = vector.broadcast %cst_137 : f32 to vector<8x256xf32>
    %272 = arith.mulf %271, %270 : vector<8x256xf32>
    %273 = arith.addf %254, %272 : vector<8x256xf32>
    %cst_138 = arith.constant 1.000000e+00 : f32
    %274 = vector.broadcast %cst_138 : f32 to vector<8x256xf32>
    %275 = arith.mulf %274, %270 : vector<8x256xf32>
    %276 = arith.addf %264, %275 : vector<8x256xf32>
    %cst_139 = arith.constant -1.000000e+00 : f32
    %277 = vector.broadcast %cst_139 : f32 to vector<8x256xf32>
    %278 = arith.mulf %277, %270 : vector<8x256xf32>
    %279 = arith.addf %267, %278 : vector<8x256xf32>
    %280 = math.absf %273 : vector<8x256xf32>
    %281 = math.absf %276 : vector<8x256xf32>
    %282 = arith.addf %280, %281 : vector<8x256xf32>
    %283 = math.absf %279 : vector<8x256xf32>
    %284 = arith.addf %282, %283 : vector<8x256xf32>
    %285 = vector.shape_cast %284 : vector<8x256xf32> to vector<1x8x256xf32>
    %cst_140 = arith.constant dense<0.000000e+00> : vector<1xf32>
    %286 = vector.multi_reduction <add>, %285, %cst_140 [1, 2] : vector<1x8x256xf32> to vector<1xf32>
    %287 = vector.shape_cast %286 : vector<1xf32> to vector<1x1x1xf32>
    %288 = vector.extract %287[0, 0, 0] : f32 from vector<1x1x1xf32>
    %289 = vector.broadcast %288 : f32 to vector<8x128xf32>
    %c0_141 = arith.constant 0 : index
    %c0_142 = arith.constant 0 : index
    %c0_143 = arith.constant 0 : index
    %c0_144 = arith.constant 0 : index
    %290 = vector.load %arg6[%c0_141, %c0_142, %c0_143, %c0_144] : memref<1x1x8x128xf32, #tpu.memory_space<vmem>>, vector<1x1x8x128xf32>
    %291 = vector.shape_cast %290 : vector<1x1x8x128xf32> to vector<8x128xf32>
    %292 = vector.shape_cast %289 : vector<8x128xf32> to vector<1x1x8x128xf32>
    tpu.vector_store %arg6[%c0_141, %c0_142, %c0_143, %c0_144], %292 {strides = array<i32>} : memref<1x1x8x128xf32, #tpu.memory_space<vmem>>, vector<1x1x8x128xf32>,
    return
  }
  func.func @transform_0(%arg0: i32, %arg1: i32) -> (i32, i32, i32) {
    %c0_i32 = arith.constant 0 : i32
    %c0_i32_0 = arith.constant 0 : i32
    return %arg0, %arg1, %c0_i32 : i32, i32, i32
  }
  func.func @transform_1(%arg0: i32, %arg1: i32) -> (i32, i32, i32) {
    %c0_i32 = arith.constant 0 : i32
    %c0_i32_0 = arith.constant 0 : i32
    return %arg0, %arg1, %c0_i32 : i32, i32, i32
  }
  func.func @transform_2(%arg0: i32, %arg1: i32) -> (i32, i32, i32, i32) {
    %c0_i32 = arith.constant 0 : i32
    %c0_i32_0 = arith.constant 0 : i32
    %c0_i32_1 = arith.constant 0 : i32
    return %arg0, %arg1, %c0_i32, %c0_i32_0 : i32, i32, i32, i32
  }
  func.func @transform_3(%arg0: i32, %arg1: i32) -> (i32, i32, i32, i32) {
    %c0_i32 = arith.constant 0 : i32
    %c0_i32_0 = arith.constant 0 : i32
    %c0_i32_1 = arith.constant 0 : i32
    return %arg0, %arg1, %c0_i32, %c0_i32_0 : i32, i32, i32, i32
  }
  func.func @transform_4(%arg0: i32, %arg1: i32) -> (i32, i32, i32, i32) {
    %c0_i32 = arith.constant 0 : i32
    %c0_i32_0 = arith.constant 0 : i32
    %c0_i32_1 = arith.constant 0 : i32
    return %arg0, %arg1, %c0_i32, %c0_i32_0 : i32, i32, i32, i32
  }
}

</mosaic_0001>

<bundles_post_ra>
// kernel: sobel_loss.1
= control target key start
LH: loop header
LB: loop body
LE: loop exit
PB: predicated region body
PF: predicated region fallthrough
CT: control target
= control target key end

     0   :  { %s2434_s15 = smov 0   ;;  %s2436_s16 = smov 0   ;;  %s4046_s0 = inlined_call_operand.vmem [shape: f32[2,16,256], index: 0, kind: input, shape index: {}]   ;;  %s4047_s1 = inlined_call_operand.vmem [shape: f32[2,16,256], index: 1, kind: input, shape index: {}]   ;;  %s4048_s2 = inlined_call_operand.vmem [shape: f32[2,2,2,256], index: 2, kind: input, shape index: {}]   ;;  %s4049_s3 = inlined_call_operand.vmem [shape: f32[2,2,2,256], index: 3, kind: input, shape index: {}]   ;;  %s4050_s4 = inlined_call_operand.vmem [shape: f32[2,2,8,128], index: 4, kind: output, shape index: {}]  }
   0x1   :  { %s2438_s17 = smov 0   ;;  %s2440_s18 = smov 0  }
   0x2   :  { %s2442_s19 = smov 0  }
   0x3 LB: > { %s23_s20 = sadd.s32 1, %s2385_s17  ;;  %s26_s21 = sadd.s32 1, %s2389_s18  ;;  %s2393_s19 = sphi %s2442_s19, %s14_s19   ;;  %s2389_s18 = sphi %s2440_s18, %s4359_s18   ;;  %s2385_s17 = sphi %s2438_s17, %s4358_s17   ;;  %s2381_s16 = sphi %s2436_s16, %s4357_s16   ;;  %s2377_s15 = sphi %s2434_s15, %s4356_s15  }
   0x4   : > { %p24_p0 = scmp.ge.s32.totalorder %s23_s20, 2  ;;  %p2251_p1 = scmp.ge.s32.totalorder %s2393_s19, 1 }
   0x5   : > { %p230_p2 = scmp.lt.s32.totalorder %s2393_s19, 5 }
   0x6   : > { %s4361_s20 = smov (%p24_p0, %s23_s20), 0  ;;  %s4363_s21 = smov (!%p24_p0, %s26_s21), %s2389_s18 }
   0x7   : > { %p231_p3 = pnand %p2251_p1, %p230_p2  ;;  %p28_p4 = scmp.ge.s32.totalorder %s4363_s21, 2 }
   0x9   : > { %s4365_s21 = smov (%p28_p4, %s4363_s21), 0  ;;  %234 = sbr.rel (%p231_p3) target bundleno = 944 (0x3b0), region = 36 }
  0x10   : > { %v355_v0 = vlaneseq  ;;  %p290_p5 = scmp.lt.s32.totalorder %s2381_s16, 1  ;;  %p292_p6 = scmp.lt.s32.totalorder %s2377_s15, 1  ;;  %v4051_v1 = vmov 0.0   ;;  %vm533_vm5 = vcmask 924672   ;;  %vm818_vm6 = vcmask 121856  }
  0x11   : > { %335 = vst [vmem:[#allocation2 + $0x8] sm:$0xff] %v4051_v1  ;;  %336 = vst [vmem:[#allocation2 + $0x10] sm:$0xff] %v4051_v1  ;;  %s2396_s13 = smov 127   ;;  %s2397_s14 = smov 111   ;;  %vm470_vm7 = vcmask 1039360   ;;  %vm756_vm8 = vcmask 7168  }
  0x12   : > { %339 = vst [vmem:[#allocation2 + $0x48] sm:$0xff] %v4051_v1  ;;  %340 = vst [vmem:[#allocation2 + $0x50] sm:$0xff] %v4051_v1  ;;  %v2480_v2 = vand.u32 127, %v355_v0  ;;  %s4367_s16 = smov (!%p290_p5, %s2381_s16), 1  ;;  %s4369_s15 = smov (!%p292_p6, %s2377_s15), 1  ;;  %vm2516_vm2 = vcmp.lt.s32.totalorder %v355_v0, 256 }
  0x13   : > { %334 = vst [vmem:[#allocation2] sm:$0xff] %v4051_v1  ;;  %337 = vst [vmem:[#allocation2 + $0x18] sm:$0xff] %v4051_v1  ;;  %s2253_s22 = sshll.u32 %s4367_s16, 2  ;;  %s2252_s23 = sshll.u32 %s4369_s15, 1  ;;  %vm953_vm9 = vcmask 138240   ;;  %vm1321_vm10 = vcmask 1045504  }
  0x14   : > { %338 = vst [vmem:[#allocation2 + $0x40] sm:$0xff] %v4051_v1  ;;  %341 = vst [vmem:[#allocation2 + $0x58] sm:$0xff] %v4051_v1  ;;  %v2493_v3 = vadd.s32 128, %v2480_v2  ;;  %v377_v4 = vand.u32 15, %v2480_v2  ;;  %s296_s24 = sadd.s32 %s2253_s22, %s2252_s23  ;;  %s2398_s22 = smov 1   ;;  %vm417_vm11 = vcmask 908288  }
  0x15   : > { %342 = vst [vmem:[#allocation2 + $0x20] sm:$0xff] %v4051_v1  ;;  %343 = vst [vmem:[#allocation2 + $0x38] sm:$0xff] %v4051_v1  ;;  %s2254_s25 = sshll.u32 %s296_s24, 3  ;;  %s2260_s26 = sshll.u32 %s296_s24, 1  ;;  %vm926_vm12 = vcmask 777216   ;;  %vm562_vm13 = vcmask 1031168  }
  0x16   : > { %v384_v5 = vand.u32 15, %v2493_v3  ;;  %vm397_vm0 = vcmp.ge.s32.totalorder %v377_v4, 1  ;;  %s298_s29 = scalar_lea.vmem %s4046_s0, %s2254_s25  ;;  %s307_s6 = scalar_lea.vmem %s4047_s1, %s2254_s25  ;;  %vm401_vm3 = vcmp.le.s32.totalorder %v377_v4, 14  ;;  %vm663_vm14 = vcmask 916480  }
  0x17   : > { %v399_v6 = vsel %vm397_vm0, 1.0, %v4051_v1  ;;  %s316_s9 = scalar_lea.vmem %s4048_s2, %s2260_s26  ;;  %s325_s12 = scalar_lea.vmem %s4049_s3, %s2260_s26  ;;  %v344_v9 = vld [vmem:[%s298_s29] sm:$0xff]  ;;  %v345_v10 = vld [vmem:[%s298_s29 + $0x8] sm:$0xff]  ;;  %v403_v39 = vsel %vm401_vm3, 1.0, %v4051_v1  ;;  %vm853_vm15 = vcmask 785408   ;;  %vm791_vm0 = vcmask 900096  }
  0x18   : > { %vm398_vm1 = vcmp.ge.s32.totalorder %v384_v5, 1  ;;  %v346_v11 = vld [vmem:[%s307_s6] sm:$0xff]  ;;  %v347_v15 = vld [vmem:[%s307_s6 + $0x8] sm:$0xff]  ;;  %vm402_vm4 = vcmp.le.s32.totalorder %v384_v5, 14  ;;  %s2399_s23 = smov 113   ;;  %s2400_s24 = smov 17  }
  0x19   : > { %v400_v8 = vsel %vm398_vm1, 1.0, %v4051_v1  ;;  %v2520_v16 = vsub.f32 %v344_v9, %v346_v11  ;;  %v352_v17 = vld [vmem:[%s316_s9] ss:$2 sm:$0x3]  ;;  %v2522_v18 = vsub.f32 %v345_v10, %v347_v15  ;;  %v404_v40 = vsel %vm402_vm4, 1.0, %v4051_v1  ;;  %s2401_s25 = smov 15  }
  0x1a   : > { %v2506_v7 = vld [vmem:[#allocation2] sm:$0x80]  ;;  %v2325_v14 = vpack.i.bf16 %v400_v8, %v399_v6  ;;  %v353_v19 = vld [vmem:[%s325_s12] ss:$2 sm:$0x3]  ;;  %v2330_v42 = vpack.i.bf16 %v404_v40, %v403_v39  ;;  %s2402_s26 = smov 95  }
  0x1b   : > { %v487_v12 = vmul.f32 2.0, %v2506_v7  ;;  %v2266_v20 = vld [vmem:[%s316_s9 + $0x1] ss:$2 sm:$0x3]  ;;  %350 = vst [vmem:[#allocation2 + $0x28] sm:$0xff] %v2520_v16  ;;  %v354_v21 = vsub.f32 %v352_v17, %v353_v19  ;;  %v446_v23 = vmul.f32 -2.0, %v2506_v7 }
  0x1c   : > { %2326 = vrot.lane.b32.xlu0 %v2325_v14, %s2397_s14  ;;  %v2267_v22 = vld [vmem:[%s325_s12 + $0x1] ss:$2 sm:$0x3]  ;;  %351 = vst [vmem:[#allocation2 + $0x30] sm:$0xff] %v2522_v18  ;;  %v2571_v44 = vld [vmem:[#allocation2 + $0x18] sm:$0x80] }
  0x1d   : > { %499 = vrot.lane.b32.xlu1 %v487_v12, %s2396_s13  ;;  %v366_v24 = vsub.f32 %v2266_v20, %v2267_v22  ;;  %v2529_v25 = vld [vmem:[#allocation2 + $0x20] sm:$0x7f]  ;;  %360 = vst.msk [vmem:[#allocation2 + $0xf] ss:$8 sm:$0x3] %vm2516_vm2, %v354_v21  ;;  %v910_v45 = vmul.f32 2.0, %v2571_v44 }
  0x1e   : > { %v449_v26 = vmul.f32 -2.0, %v2529_v25  ;;  %v490_v27 = vmul.f32 2.0, %v2529_v25  ;;  %s2403_s27 = smov 126   ;;  %s2404_s28 = smov 96   ;;  %vm982_vm1 = vcmask 769024  }
  0x1f   : > { %368 = vst.msk [vmem:[#allocation2 + $0x48] ss:$8 sm:$0x3] %vm2516_vm2, %v366_v24  ;;  %s2405_s29 = smov 112   ;;  %s2406_s30 = smov 110   ;;  %vm2063_vm2 = vcmask 1040384  }
  0x20   : > { %458 = vrot.lane.b32.xlu0 %v446_v23, %s2396_s13  ;;  %s2407_s5 = smov 94   ;;  %s2264_s6 = sshll.u32 %s4367_s16, 1 }
  0x21   : > { %s331_s7 = sadd.s32 %s2264_s6, %s4369_s15 }
  0x22   : > { %v2550_v34 = vld [vmem:[#allocation2 + $0x28] sm:$0x7f]  ;;  %s2265_s8 = sshll.u32 %s331_s7, 3 }
  0x23   : > { %v2543_v30 = vld [vmem:[#allocation2 + $0x30] sm:$0x7f]  ;;  %v450_v35 = vmul.f32 -2.0, %v2550_v34  ;;  %v491_v41 = vmul.f32 2.0, %v2550_v34  ;;  %s333_s11 = scalar_lea.vmem %s4050_s4, %s2265_s8 }
  0x24   : > { %464 = vrot.lane.b32.xlu0 %v449_v26, %s2396_s13  ;;  %v2539_v28 = vld [vmem:[#allocation2 + $0x8] sm:$0x80]  ;;  %v2541_v29 = vld [vmem:[#allocation2 + $0x10] sm:$0x80]  ;;  %v451_v33 = vmul.f32 -2.0, %v2543_v30  ;;  %v492_v38 = vmul.f32 2.0, %v2543_v30 }
  0x25   : > { %v447_v31 = vmul.f32 -2.0, %v2539_v28  ;;  %v448_v32 = vmul.f32 -2.0, %v2541_v29  ;;  %v488_v36 = vmul.f32 2.0, %v2539_v28  ;;  %v489_v37 = vmul.f32 2.0, %v2541_v29 }
  0x26   : > { %v720_v43 = vmul.f32 4.0, %v2539_v28 }
  0x27   : > { %460 = vrot.lane.b32.xlu1 %v447_v31, %s2396_s13  ;;  %v2648_v31 = vld [vmem:[#allocation2 + $0x38] sm:$0x7f] }
  0x28   : > { %505 = vrot.lane.b32.xlu0 %v490_v27, %s2396_s13 }
  0x2b   : > { %462 = vrot.lane.b32.xlu1 %v448_v32, %s2396_s13 }
  0x2c   : > { %468 = vrot.lane.b32.xlu0 %v451_v33, %s2396_s13 }
  0x2f   : > { %466 = vrot.lane.b32.xlu1 %v450_v35, %s2396_s13 }
  0x30   : > { %501 = vrot.lane.b32.xlu0 %v488_v36, %s2396_s13 }
  0x33   : > { %503 = vrot.lane.b32.xlu1 %v489_v37, %s2396_s13 }
  0x34   : > { %509 = vrot.lane.b32.xlu0 %v492_v38, %s2396_s13 }
  0x37   : > { %507 = vrot.lane.b32.xlu1 %v491_v41, %s2396_s13 }
  0x38   : > { %2341 = vrot.lane.b32.xlu0 %v2330_v42, %s2398_s22 }
  0x3b   : > { %2331 = vrot.lane.b32.xlu1 %v2330_v42, %s2399_s23 }
  0x3c   : > { %2351 = vrot.lane.b32.xlu0 %v2330_v42, %s2400_s24 }
  0x3f   : > { %2336 = vrot.lane.b32.xlu1 %v2325_v14, %s2396_s13 }
  0x40   : > { %728 = vrot.lane.b32.xlu0 %v720_v43, %s2397_s14 }
  0x43   : > { %2346 = vrot.lane.b32.xlu1 %v2325_v14, %s2401_s25 }
  0x44   : > { %916 = vrot.lane.b32.xlu0 %v489_v37, %s2402_s26 }
  0x47   : > { %914 = vrot.lane.b32.xlu1 %v488_v36, %s2402_s26 }
  0x48   : > { %920 = vrot.lane.b32.xlu0 %v491_v41, %s2402_s26 }
  0x4b   : > { %918 = vrot.lane.b32.xlu1 %v910_v45, %s2402_s26 }
  0x4f   : > { %922 = vrot.lane.b32.xlu1 %v492_v38, %s2402_s26 }
  0x8e   : > { %v2580_v47 = vpop.permute.xlu0 %2326 }
  0x8f   : > { %v2578_v46 = vpop.permute.xlu1 %499 }
  0x92   : > { %v2584_v49 = vpop.permute.xlu0 %458 }
  0x96   : > { %v2590_v52 = vpop.permute.xlu0 %464 }
  0x99   : > { %v2582_v48 = vpop.permute.xlu1 %460 }
  0x9a   : > { %v2594_v54 = vpop.permute.xlu0 %505 }
  0x9d   : > { %v2586_v50 = vpop.permute.xlu1 %462 }
  0x9e   : > { %v2600_v58 = vpop.permute.xlu0 %468 }
  0xa1   : > { %v2588_v51 = vpop.permute.xlu1 %466 }
  0xa2   : > { %v2608_v62 = vpop.permute.xlu0 %501 }
  0xa5   : > { %v2592_v53 = vpop.permute.xlu1 %503 }
  0xa6   : > { %v2620_v5 = vpop.permute.xlu0 %509 }
  0xa9   : > { %v2596_v55 = vpop.permute.xlu1 %507 }
  0xaa   : > { %v2342_v10 = vpop.permute.xlu0 %2341 }
  0xab   : > { %v2636_v15 = vunpack.i.l.bf16 %v2342_v10 }
  0xad   : > { %v2332_v56 = vpop.permute.xlu1 %2331  ;;  %v761_v20 = vmul.f32 %v2636_v15, %v2539_v28  ;;  %v764_v21 = vmul.f32 %v2636_v15, %v2550_v34 }
  0xae   : > { %v2598_v57 = vunpack.i.l.bf16 %v2332_v56  ;;  %v2612_v2 = vunpack.i.h.bf16 %v2332_v56 }
  0xaf   : > { %v767_v24 = vmul.f32 2.0, %v761_v20  ;;  %v770_v26 = vmul.f32 2.0, %v764_v21 }
  0xb0   : > { %v541_v59 = vmul.f32 %v2598_v57, %v2529_v25  ;;  %v538_v60 = vmul.f32 %v2598_v57, %v2506_v7  ;;  %v543_v8 = vmul.f32 %v2612_v2, %v2543_v30  ;;  %v540_v9 = vmul.f32 %v2612_v2, %v2541_v29 }
  0xb1   : > { %v2337_v61 = vpop.permute.xlu1 %2336  ;;  %v2660_v37 = vsel %vm533_vm5, %v2598_v57, %v2612_v2 }
  0xb2   : > { %556 = vrot.lane.b32.xlu1 %v541_v59, %s2403_s27  ;;  %550 = vrot.lane.b32.xlu0 %v538_v60, %s2403_s27  ;;  %v2622_v6 = vunpack.i.l.bf16 %v2337_v61  ;;  %v582_v11 = vmul.f32 -1.0, %v541_v59  ;;  %v579_v12 = vmul.f32 -1.0, %v538_v60  ;;  %v542_v38 = vmul.f32 %v2660_v37, %v2550_v34 }
  0xb3   : > { %v539_v39 = vmul.f32 %v2660_v37, %v2539_v28  ;;  %v2674_v41 = vunpack.i.h.bf16 %v2337_v61  ;;  %v581_v45 = vmul.f32 -1.0, %v540_v9  ;;  %v584_v56 = vmul.f32 -1.0, %v543_v8 }
  0xb4   : > { %v636_v13 = vmul.f32 %v2622_v6, %v2529_v25  ;;  %v633_v14 = vmul.f32 %v2622_v6, %v2506_v7  ;;  %v2688_v61 = vunpack.i.h.bf16 %v2342_v10 }
  0xb5   : > { %v2347_v63 = vpop.permute.xlu1 %2346  ;;  %v635_v59 = vmul.f32 %v2674_v41, %v2541_v29  ;;  %v638_v60 = vmul.f32 %v2674_v41, %v2543_v30  ;;  %v580_v20 = vmul.f32 -1.0, %v539_v39 }
  0xb6   : > { %v2610_v0 = vunpack.i.l.bf16 %v2347_v63  ;;  %v642_v17 = vmul.f32 -2.0, %v636_v13  ;;  %v639_v19 = vmul.f32 -2.0, %v633_v14  ;;  %v683_v22 = vmul.f32 2.0, %v636_v13 }
  0xb7   : > { %v680_v23 = vmul.f32 2.0, %v633_v14  ;;  %v2646_v27 = vunpack.i.h.bf16 %v2347_v63  ;;  %v641_v63 = vmul.f32 -2.0, %v635_v59 }
  0xb8   : > { %4136 = vst [vmem:[#allocation3_spill] sm:$0xff] %v2610_v0  ;;  %v823_v3 = vmul.f32 %v2610_v0, %v2539_v28  ;;  %v826_v4 = vmul.f32 %v2610_v0, %v2550_v34 }
  0xb9   : > { %4137 = vst [vmem:[#allocation4_spill] sm:$0xff] %v2646_v27  ;;  %v825_v32 = vmul.f32 %v2646_v27, %v2571_v44  ;;  %v828_v33 = vmul.f32 %v2646_v27, %v2648_v31  ;;  %v2670_v40 = vsel %vm818_vm6, %v2610_v0, %v2646_v27 }
  0xba   : > { %876 = vrot.lane.b32.xlu1 %v823_v3, %s2404_s28  ;;  %882 = vrot.lane.b32.xlu0 %v826_v4, %s2404_s28  ;;  %v829_v35 = vmul.f32 -1.0, %v823_v3  ;;  %v832_v36 = vmul.f32 -1.0, %v826_v4  ;;  %4138 = vst [vmem:[#allocation5_spill] sm:$0xff] %v2670_v40  ;;  %v824_v42 = vmul.f32 %v2670_v40, %v2541_v29  ;;  %v827_v43 = vmul.f32 %v2670_v40, %v2543_v30 }
  0xbb   : > { %v644_v3 = vmul.f32 -2.0, %v638_v60  ;;  %v682_v4 = vmul.f32 2.0, %v635_v59  ;;  %v834_v13 = vmul.f32 -1.0, %v828_v33  ;;  %v831_v14 = vmul.f32 -1.0, %v825_v32  ;;  %v2352_v59 = vpop.permute.xlu0 %2351 }
  0xbe   : > { %560 = vrot.lane.b32.xlu1 %v543_v8, %s2403_s27  ;;  %554 = vrot.lane.b32.xlu0 %v540_v9, %s2403_s27  ;;  %v685_v8 = vmul.f32 2.0, %v638_v60  ;;  %v766_v9 = vmul.f32 %v2688_v61, %v2648_v31  ;;  %v911_v60 = vmul.f32 2.0, %v2648_v31 }
  0xc0   : > { %v772_v10 = vmul.f32 2.0, %v766_v9 }
  0xc2   : > { %597 = vrot.lane.b32.xlu1 %v582_v11, %s2403_s27  ;;  %591 = vrot.lane.b32.xlu0 %v579_v12, %s2403_s27  ;;  %v763_v11 = vmul.f32 %v2688_v61, %v2571_v44 }
  0xc4   : > { %v769_v12 = vmul.f32 2.0, %v763_v11 }
  0xc6   : > { %657 = vrot.lane.b32.xlu1 %v642_v17, %s2405_s29  ;;  %651 = vrot.lane.b32.xlu0 %v639_v19, %s2405_s29  ;;  %v2703_v17 = vsel %vm470_vm7, %v2622_v6, %v2674_v41  ;;  %v583_v19 = vmul.f32 -1.0, %v542_v38 }
  0xc7   : > { %v637_v21 = vmul.f32 %v2703_v17, %v2550_v34 }
  0xca   : > { %698 = vrot.lane.b32.xlu1 %v683_v22, %s2405_s29  ;;  %692 = vrot.lane.b32.xlu0 %v680_v23, %s2405_s29  ;;  %v634_v22 = vmul.f32 %v2703_v17, %v2539_v28  ;;  %v643_v23 = vmul.f32 -2.0, %v637_v21 }
  0xce   : > { %779 = vrot.lane.b32.xlu1 %v767_v24, %s2406_s30  ;;  %785 = vrot.lane.b32.xlu0 %v770_v26, %s2406_s30  ;;  %v640_v24 = vmul.f32 -2.0, %v634_v22  ;;  %v2715_v26 = vsel %vm756_vm8, %v2636_v15, %v2688_v61 }
  0xd2   : > { %880 = vrot.lane.b32.xlu1 %v825_v32, %s2404_s28  ;;  %886 = vrot.lane.b32.xlu0 %v828_v33, %s2404_s28  ;;  %v684_v32 = vmul.f32 2.0, %v637_v21  ;;  %v681_v33 = vmul.f32 2.0, %v634_v22  ;;  %v2408_v22 = vmov -0.0  }
  0xd6   : > { %841 = vrot.lane.b32.xlu1 %v829_v35, %s2404_s28  ;;  %847 = vrot.lane.b32.xlu0 %v832_v36, %s2404_s28  ;;  %v762_v35 = vmul.f32 %v2715_v26, %v2541_v29  ;;  %v765_v36 = vmul.f32 %v2715_v26, %v2543_v30 }
  0xda   : > { %558 = vrot.lane.b32.xlu0 %v542_v38, %s2403_s27  ;;  %552 = vrot.lane.b32.xlu1 %v539_v39, %s2403_s27  ;;  %v768_v38 = vmul.f32 2.0, %v762_v35  ;;  %v771_v39 = vmul.f32 2.0, %v765_v36 }
  0xde   : > { %878 = vrot.lane.b32.xlu0 %v824_v42, %s2404_s28  ;;  %884 = vrot.lane.b32.xlu1 %v827_v43, %s2404_s28 }
  0xe2   : > { %595 = vrot.lane.b32.xlu0 %v581_v45, %s2403_s27  ;;  %601 = vrot.lane.b32.xlu1 %v584_v56, %s2403_s27  ;;  %v830_v45 = vmul.f32 -1.0, %v824_v42  ;;  %v833_v56 = vmul.f32 -1.0, %v827_v43  ;;  %v722_v42 = vmul.f32 4.0, %v2550_v34  ;;  %v723_v43 = vmul.f32 4.0, %v2543_v30 }
  0xe6   : > { %655 = vrot.lane.b32.xlu0 %v641_v63, %s2405_s29  ;;  %661 = vrot.lane.b32.xlu1 %v644_v3, %s2405_s29  ;;  %v721_v63 = vmul.f32 4.0, %v2541_v29  ;;  %v2731_v3 = vunpack.i.h.bf16 %v2352_v59 }
  0xe8   : > { %4139 = vst [vmem:[#allocation6_spill] sm:$0xff] %v2731_v3  ;;  %v963_v21 = vmul.f32 %v2731_v3, %v2648_v31  ;;  %v1069_v31 = vmul.f32 %v2612_v2, %v2522_v18 }
  0xea   : > { %696 = vrot.lane.b32.xlu0 %v682_v4, %s2405_s29  ;;  %702 = vrot.lane.b32.xlu1 %v685_v8, %s2405_s29  ;;  %v2733_v4 = vunpack.i.l.bf16 %v2352_v59  ;;  %v1072_v59 = vmul.f32 2.0, %v1069_v31 }
  0xec   : > { %4140 = vst [vmem:[#allocation7_spill] sm:$0xff] %v2733_v4  ;;  %v2742_v8 = vsel %vm953_vm9, %v2733_v4, %v2731_v3  ;;  %v958_v9 = vmul.f32 %v2733_v4, %v2539_v28 }
  0xed   : > { %4141 = vst [vmem:[#allocation8_spill] sm:$0xff] %v2742_v8  ;;  %v959_v11 = vmul.f32 %v2742_v8, %v2541_v29 }
  0xee   : > { %789 = vrot.lane.b32.xlu0 %v772_v10, %s2406_s30  ;;  %783 = vrot.lane.b32.xlu1 %v769_v12, %s2406_s30  ;;  %v960_v10 = vmul.f32 %v2731_v3, %v2571_v44  ;;  %v961_v12 = vmul.f32 %v2733_v4, %v2550_v34  ;;  %v1067_v44 = vmul.f32 0.0, %v2598_v57 }
  0xf0   : > { %v1070_v36 = vmul.f32 2.0, %v1067_v44 }
  0xf2   : > { %851 = vrot.lane.b32.xlu0 %v834_v13, %s2404_s28  ;;  %845 = vrot.lane.b32.xlu1 %v831_v14, %s2404_s28  ;;  %v2758_v13 = vpop.permute.xlu0 %728  ;;  %v2760_v14 = vpop.permute.xlu1 %914 }
  0xf3   : > { %4142 = vst [vmem:[#allocation9_spill] sm:$0xff] %v2758_v13  ;;  %4143 = vst [vmem:[#allocation10_spill] sm:$0xff] %v2760_v14 }
  0xf6   : > { %599 = vrot.lane.b32.xlu0 %v583_v19, %s2403_s27  ;;  %593 = vrot.lane.b32.xlu1 %v580_v20, %s2403_s27  ;;  %v1042_v19 = vmul.f32 -4.0, %v2520_v16  ;;  %v962_v20 = vmul.f32 %v2742_v8, %v2543_v30  ;;  %v2773_v35 = vpop.permute.xlu1 %918 }
  0xfa   : > { %659 = vrot.lane.b32.xlu0 %v643_v23, %s2405_s29  ;;  %653 = vrot.lane.b32.xlu1 %v640_v24, %s2405_s29  ;;  %v1047_v23 = vrot.slane %v2408_v22, 1  ;;  %v1048_v24 = vrot.slane %v1042_v19, 1  ;;  %v1124_v19 = vmul.f32 %v2674_v41, %v2522_v18 }
  0xfe   : > { %700 = vrot.lane.b32.xlu0 %v684_v32, %s2405_s29  ;;  %694 = vrot.lane.b32.xlu1 %v681_v33, %s2405_s29  ;;  %v1043_v32 = vmul.f32 -4.0, %v2522_v18  ;;  %v2771_v33 = vpop.permute.xlu0 %916 }
 0x102   : > { %781 = vrot.lane.b32.xlu0 %v768_v38, %s2406_s30  ;;  %787 = vrot.lane.b32.xlu1 %v771_v39, %s2406_s30  ;;  %v1068_v38 = vmul.f32 %v2660_v37, %v2520_v16  ;;  %v1049_v39 = vrot.slane %v1043_v32, 1 }
 0x106   : > { %843 = vrot.lane.b32.xlu0 %v830_v45, %s2404_s28  ;;  %849 = vrot.lane.b32.xlu1 %v833_v56, %s2404_s28  ;;  %v1076_v45 = vrot.slane %v1070_v36, 1  ;;  %v1071_v56 = vmul.f32 2.0, %v1068_v38  ;;  %v1152_v36 = vmul.f32 %v2636_v15, %v2520_v16 }
 0x10a   : > { %924 = vrot.lane.b32.xlu0 %v911_v60, %s2402_s26  ;;  %730 = vrot.lane.b32.xlu1 %v721_v63, %s2397_s14  ;;  %v2781_v60 = vpop.permute.xlu0 %920  ;;  %v2783_v63 = vpop.permute.xlu1 %922 }
 0x10b   : > { %4144 = vst [vmem:[#allocation11_spill] sm:$0xff] %v2781_v60  ;;  %4145 = vst [vmem:[#allocation12_spill] sm:$0xff] %v2783_v63 }
 0x10e   : > { %732 = vrot.lane.b32.xlu0 %v722_v42, %s2397_s14  ;;  %734 = vrot.lane.b32.xlu1 %v723_v43, %s2397_s14  ;;  %v1122_v42 = vmul.f32 0.0, %v2622_v6  ;;  %v1077_v43 = vrot.slane %v1071_v56, 1 }
 0x110   : > { %v1125_v32 = vmul.f32 -4.0, %v1122_v42  ;;  %v1154_v42 = vmul.f32 0.0, %v2688_v61 }
 0x112   : > { %970 = vrot.lane.b32.xlu0 %v958_v9, %s2407_s5  ;;  %972 = vrot.lane.b32.xlu1 %v959_v11, %s2407_s5  ;;  %v1078_v9 = vrot.slane %v1072_v59, 1  ;;  %v1096_v11 = vmul.f32 -2.0, %v1067_v44  ;;  %v1131_v56 = vrot.slane %v1125_v32, 1  ;;  %v1127_v59 = vmul.f32 -4.0, %v1124_v19 }
 0x113   : > { %v1181_v19 = vmul.f32 %v2610_v0, %v2520_v16 }
 0x114   : > { %v1102_v22 = vrot.slane %v1096_v11, 1 }
 0x116   : > { %974 = vrot.lane.b32.xlu0 %v960_v10, %s2407_s5  ;;  %976 = vrot.lane.b32.xlu1 %v961_v12, %s2407_s5  ;;  %v1097_v10 = vmul.f32 -2.0, %v1068_v38  ;;  %v1123_v12 = vmul.f32 %v2703_v17, %v2520_v16 }
 0x118   : > { %v1126_v44 = vmul.f32 -4.0, %v1123_v12  ;;  %v1133_v12 = vrot.slane %v1127_v59, 1  ;;  %v1183_v59 = vmul.f32 0.0, %v2646_v27 }
 0x11a   : > { %978 = vrot.lane.b32.xlu0 %v962_v20, %s2407_s5  ;;  %980 = vrot.lane.b32.xlu1 %v963_v21, %s2407_s5  ;;  %v1212_v1 = vmul.f32 2.0, %v1183_v59 }
 0x11e   : > { %1050 = vrot.lane.b32.xlu0 %v1047_v23, %s2396_s13  ;;  %1052 = vrot.lane.b32.xlu1 %v1048_v24, %s2396_s13  ;;  %v1103_v23 = vrot.slane %v1097_v10, 1  ;;  %v1098_v24 = vmul.f32 -2.0, %v1069_v31  ;;  %v1155_v31 = vmul.f32 4.0, %v1152_v36  ;;  %v1132_v10 = vrot.slane %v1126_v44, 1 }
 0x11f   : > { %v1182_v44 = vmul.f32 %v2670_v40, %v2522_v18 }
 0x122   : > { %1054 = vrot.lane.b32.xlu0 %v1049_v39, %s2396_s13  ;;  %1079 = vrot.lane.b32.xlu1 %v1076_v45, %s2403_s27  ;;  %v1104_v45 = vrot.slane %v1098_v24, 1  ;;  %v1157_v24 = vmul.f32 4.0, %v1154_v42 }
 0x124   : > { %v2794_v20 = vpop.permute.xlu1 %556  ;;  %v2796_v21 = vpop.permute.xlu0 %550 }
 0x125   : > { %4146 = vst [vmem:[#allocation13_spill] sm:$0xff] %v2794_v20  ;;  %4147 = vst [vmem:[#allocation14_spill] sm:$0xff] %v2796_v21 }
 0x126   : > { %1081 = vrot.lane.b32.xlu0 %v1077_v43, %s2403_s27  ;;  %1083 = vrot.lane.b32.xlu1 %v1078_v9, %s2403_s27  ;;  %v1153_v43 = vmul.f32 %v2715_v26, %v2522_v18 }
 0x12a   : > { %1105 = vrot.lane.b32.xlu0 %v1102_v22, %s2403_s27  ;;  %1107 = vrot.lane.b32.xlu1 %v1103_v23, %s2403_s27  ;;  %v1156_v22 = vmul.f32 4.0, %v1153_v43  ;;  %v1161_v23 = vrot.slane %v1155_v31, 1  ;;  %v1163_v31 = vrot.slane %v1157_v24, 1  ;;  %v1236_v24 = vmul.f32 4.0, %v2520_v16 }
 0x12c   : > { %v2802_v38 = vpop.permute.xlu1 %876  ;;  %v2804_v39 = vpop.permute.xlu0 %882 }
 0x12d   : > { %4148 = vst [vmem:[#allocation15_spill] sm:$0xff] %v2802_v38  ;;  %4149 = vst [vmem:[#allocation16_spill] sm:$0xff] %v2804_v39  ;;  %v1186_v38 = vmul.f32 -2.0, %v1183_v59 }
 0x12e   : > { %1109 = vrot.lane.b32.xlu0 %v1104_v45, %s2403_s27  ;;  %1134 = vrot.lane.b32.xlu1 %v1131_v56, %s2405_s29  ;;  %v1162_v45 = vrot.slane %v1156_v22, 1  ;;  %v1210_v56 = vmul.f32 2.0, %v1181_v19 }
 0x130   : > { %v2811_v9 = vpop.permute.xlu1 %560  ;;  %v2813_v11 = vpop.permute.xlu0 %554  ;;  %v1216_v42 = vrot.slane %v1210_v56, 1 }
 0x131   : > { %4150 = vst [vmem:[#allocation17_spill] sm:$0xff] %v2811_v9  ;;  %4151 = vst [vmem:[#allocation18_spill] sm:$0xff] %v2813_v11  ;;  %v2892_v9 = vld [vmem:[#allocation2 + $0x50] sm:$0x1] }
 0x132   : > { %1136 = vrot.lane.b32.xlu0 %v1132_v10, %s2405_s29  ;;  %1138 = vrot.lane.b32.xlu1 %v1133_v12, %s2405_s29  ;;  %v1211_v12 = vmul.f32 2.0, %v1182_v44  ;;  %v1360_v11 = vmul.f32 -2.0, %v2892_v9 }
 0x134   : > { %v2819_v32 = vpop.permute.xlu1 %597  ;;  %v2821_v36 = vpop.permute.xlu0 %591 }
 0x135   : > { %4152 = vst [vmem:[#allocation19_spill] sm:$0xff] %v2819_v32  ;;  %4153 = vst [vmem:[#allocation20_spill] sm:$0xff] %v2821_v36  ;;  %v1217_v36 = vrot.slane %v1211_v12, 1  ;;  %v1184_v32 = vmul.f32 -2.0, %v1181_v19  ;;  %v1237_v19 = vmul.f32 4.0, %v2522_v18  ;;  %v1192_v12 = vrot.slane %v1186_v38, 1 }
 0x136   : > { %1164 = vrot.lane.b32.xlu0 %v1161_v23, %s2406_s30  ;;  %1166 = vrot.lane.b32.xlu1 %v1162_v45, %s2406_s30  ;;  %v1218_v23 = vrot.slane %v1212_v1, 1  ;;  %v1185_v45 = vmul.f32 -2.0, %v1182_v44  ;;  %v1242_v1 = vrot.slane %v1236_v24, 1  ;;  %v1264_v38 = vmul.f32 0.0, %v2731_v3 }
 0x137   : > { %v1243_v59 = vrot.slane %v1237_v19, 1 }
 0x138   : > { %v2828_v43 = vpop.permute.xlu1 %657  ;;  %v2830_v10 = vpop.permute.xlu0 %651 }
 0x139   : > { %4154 = vst [vmem:[#allocation21_spill] sm:$0xff] %v2828_v43  ;;  %4155 = vst [vmem:[#allocation22_spill] sm:$0xff] %v2830_v10 }
 0x13a   : > { %1168 = vrot.lane.b32.xlu0 %v1163_v31, %s2406_s30  ;;  %1219 = vrot.lane.b32.xlu1 %v1216_v42, %s2404_s28  ;;  %v1190_v31 = vrot.slane %v1184_v32, 1  ;;  %v1191_v42 = vrot.slane %v1185_v45, 1  ;;  %v1263_v32 = vmul.f32 %v2742_v8, %v2522_v18  ;;  %v4162_v45 = vmov 0.0   ;;  %v2866_v8 = vld [vmem:[#allocation2 + $0x20] sm:$0xfe] }
 0x13b   : > { %v1244_v24 = vrot.slane %v4162_v45, 1 }
 0x13c   : > { %v2834_v22 = vpop.permute.xlu1 %698  ;;  %v2836_v13 = vpop.permute.xlu0 %692 }
 0x13d   : > { %4156 = vst [vmem:[#allocation23_spill] sm:$0xff] %v2834_v22  ;;  %4157 = vst [vmem:[#allocation24_spill] sm:$0xff] %v2836_v13  ;;  %v1266_v13 = vmul.f32 2.0, %v1263_v32  ;;  %v2877_v32 = vld [vmem:[#allocation2 + $0x30] sm:$0xfe] }
 0x13e   : > { %1221 = vrot.lane.b32.xlu0 %v1217_v36, %s2404_s28  ;;  %1223 = vrot.lane.b32.xlu1 %v1218_v23, %s2404_s28  ;;  %v1262_v23 = vmul.f32 %v2733_v4, %v2520_v16  ;;  %v1357_v3 = vmul.f32 -2.0, %v2877_v32 }
 0x140   : > { %v2841_v56 = vpop.permute.xlu1 %779  ;;  %v2843_v39 = vpop.permute.xlu0 %785  ;;  %v1265_v22 = vmul.f32 2.0, %v1262_v23 }
 0x141   : > { %4158 = vst [vmem:[#allocation25_spill] sm:$0xff] %v2841_v56  ;;  %4159 = vst [vmem:[#allocation26_spill] sm:$0xff] %v2843_v39 }
 0x142   : > { %1193 = vrot.lane.b32.xlu0 %v1190_v31, %s2404_s28  ;;  %1195 = vrot.lane.b32.xlu1 %v1191_v42, %s2404_s28  ;;  %v1271_v45 = vrot.slane %v1265_v22, 1  ;;  %v2884_v22 = vld [vmem:[#allocation2 + $0x48] sm:$0x1] }
 0x144   : > { %v2848_v44 = vpop.permute.xlu1 %880  ;;  %v2850_v36 = vpop.permute.xlu0 %886 }
 0x145   : > { %4160 = vst [vmem:[#allocation27_spill] sm:$0xff] %v2848_v44  ;;  %4161 = vst [vmem:[#allocation28_spill] sm:$0xff] %v2850_v36  ;;  %v1267_v36 = vmul.f32 2.0, %v1264_v38  ;;  %v1359_v44 = vmul.f32 -2.0, %v2884_v22 }
 0x146   : > { %1197 = vrot.lane.b32.xlu0 %v1192_v12, %s2404_s28  ;;  %1245 = vrot.lane.b32.xlu1 %v1242_v1, %s2402_s26  ;;  %v1355_v12 = vmul.f32 -2.0, %v2866_v8 }
 0x148   : > { %v2859_v31 = vpop.permute.xlu1 %841  ;;  %v2861_v42 = vpop.permute.xlu0 %847 }
 0x149   : > { %4163 = vst [vmem:[#allocation29_spill] sm:$0xff] %v2859_v31  ;;  %4164 = vst [vmem:[#allocation30_spill] sm:$0xff] %v2861_v42  ;;  %v1272_v31 = vrot.slane %v1266_v13, 1  ;;  %v2873_v42 = vld [vmem:[#allocation2 + $0x28] sm:$0xfe] }
 0x14a   : > { %1247 = vrot.lane.b32.xlu0 %v1243_v59, %s2402_s26  ;;  %1249 = vrot.lane.b32.xlu1 %v1244_v24, %s2402_s26  ;;  %v1356_v23 = vmul.f32 -2.0, %v2873_v42  ;;  %v2879_v59 = vld [vmem:[#allocation2 + $0x40] sm:$0x1]  ;;  %v1367_v24 = vrot.slane %v1355_v12, 2 }
 0x14b   : > { %v1358_v56 = vmul.f32 -2.0, %v2879_v59 }
 0x14c   : > { %v2869_v1 = vpop.permute.xlu0 %558  ;;  %v2871_v19 = vpop.permute.xlu1 %552  ;;  %v1368_v39 = vrot.slane %v1356_v23, 2 }
 0x14d   : > { %4165 = vst [vmem:[#allocation31_spill] sm:$0xff] %v2869_v1  ;;  %4166 = vst [vmem:[#allocation32_spill] sm:$0xff] %v2871_v19  ;;  %v1370_v12 = vrot.slane %v1358_v56, 2 }
 0x14e   : > { %1274 = vrot.lane.b32.xlu0 %v1271_v45, %s2407_s5  ;;  %1276 = vrot.lane.b32.xlu1 %v1272_v31, %s2407_s5  ;;  %v1273_v45 = vrot.slane %v1267_v36, 1  ;;  %v1369_v31 = vrot.slane %v1357_v3, 2  ;;  %v2902_v36 = vmul.f32 %v2598_v57, %v2866_v8  ;;  %v1374_v3 = vrot.slane %v1360_v11, 2 }
 0x14f   : > { %v1371_v23 = vsel %vm1321_vm10, %v1367_v24, %v1370_v12  ;;  %v2928_v11 = vmul.f32 %v2884_v22, %v2660_v37 }
 0x150   : > { %v2886_v13 = vpop.permute.xlu0 %878  ;;  %v2888_v38 = vpop.permute.xlu1 %884 }
 0x151   : > { %4167 = vst [vmem:[#allocation33_spill] sm:$0xff] %v2886_v13  ;;  %4168 = vst [vmem:[#allocation34_spill] sm:$0xff] %v2888_v38  ;;  %v1372_v13 = vrot.slane %v1359_v44, 2  ;;  %v2914_v44 = vmul.f32 %v2873_v42, %v2660_v37  ;;  %v2919_v38 = vmul.f32 %v2612_v2, %v2877_v32  ;;  %v2942_v37 = vmul.f32 %v2612_v2, %v2892_v9 }
 0x152   : > { %1278 = vrot.lane.b32.xlu0 %v1273_v45, %s2407_s5  ;;  %1376 = vrot.lane.b32.xlu1 %v1367_v24, %s2396_s13  ;;  %v2923_v24 = vmul.f32 %v2598_v57, %v2879_v59 }
 0x153   : > { %v1461_v21 = vmul.f32 -1.0, %v2919_v38  ;;  %v1464_v2 = vmul.f32 -1.0, %v2942_v37 }
 0x154   : > { %v2896_v10 = vpop.permute.xlu0 %595  ;;  %v2898_v43 = vpop.permute.xlu1 %601 }
 0x155   : > { %4169 = vst [vmem:[#allocation35_spill] sm:$0xff] %v2896_v10  ;;  %4170 = vst [vmem:[#allocation36_spill] sm:$0xff] %v2898_v43  ;;  %v1373_v10 = vsel %vm1321_vm10, %v1368_v39, %v1372_v13  ;;  %v1459_v43 = vmul.f32 -1.0, %v2902_v36  ;;  %v2329_v13 = vunpack.i.h.bf16 %v2580_v47  ;;  %v1473_v19 = vrot.slane %v1461_v21, 2 }
 0x156   : > { %1378 = vrot.lane.b32.xlu0 %v1368_v39, %s2396_s13  ;;  %1380 = vrot.lane.b32.xlu1 %v1369_v31, %s2396_s13  ;;  %v1375_v39 = vsel %vm1321_vm10, %v1369_v31, %v1374_v3  ;;  %v1463_v31 = vmul.f32 -1.0, %v2928_v11  ;;  %v1478_v60 = vrot.slane %v1464_v2, 2  ;;  %v1422_v2 = vrot.slane %v2902_v36, 2 }
 0x157   : > { %v1471_v57 = vrot.slane %v1459_v43, 2  ;;  %v1016_v63 = vmul.f32 %v2329_v13, %v2522_v18 }
 0x158   : > { %v2907_v56 = vpop.permute.xlu0 %655  ;;  %v2909_v45 = vpop.permute.xlu1 %661  ;;  %v1476_v20 = vrot.slane %v1463_v31, 2 }
 0x159   : > { %4171 = vst [vmem:[#allocation37_spill] sm:$0xff] %v2907_v56  ;;  %4172 = vst [vmem:[#allocation38_spill] sm:$0xff] %v2909_v45  ;;  %v1460_v56 = vmul.f32 -1.0, %v2914_v44 }
 0x15a   : > { %1382 = vrot.lane.b32.xlu0 %v1371_v23, %s2396_s13  ;;  %1384 = vrot.lane.b32.xlu1 %v1373_v10, %s2396_s13  ;;  %v1462_v23 = vmul.f32 -1.0, %v2923_v24  ;;  %v2328_v10 = vunpack.i.l.bf16 %v2580_v47 }
 0x15c   : > { %v2933_v12 = vpop.permute.xlu0 %696  ;;  %v2935_v45 = vpop.permute.xlu1 %702  ;;  %v1474_v4 = vrot.slane %v1462_v23, 2  ;;  %v2955_v47 = vmul.f32 %v2328_v10, %v2506_v7  ;;  %v1014_v31 = vmul.f32 0.0, %v2328_v10 }
 0x15d   : > { %4173 = vst [vmem:[#allocation39_spill] sm:$0xff] %v2933_v12  ;;  %4174 = vst [vmem:[#allocation40_spill] sm:$0xff] %v2935_v45  ;;  %v1472_v45 = vrot.slane %v1460_v56, 2  ;;  %v418_v12 = vsel %vm417_vm11, %v2328_v10, %v2329_v13  ;;  %v1306_v56 = vmul.f32 %v2328_v10, %v2879_v59 }
 0x15e   : > { %1386 = vrot.lane.b32.xlu0 %v1375_v39, %s2396_s13  ;;  %1480 = vrot.lane.b32.xlu1 %v1471_v57, %s2403_s27  ;;  %v2958_v39 = vmul.f32 %v2329_v13, %v2541_v29  ;;  %v1304_v21 = vmul.f32 %v2873_v42, %v418_v12  ;;  %v1307_v7 = vmul.f32 %v2884_v22, %v418_v12 }
 0x15f   : > { %v2970_v23 = vmul.f32 %v418_v12, %v2539_v28  ;;  %v2973_v29 = vmul.f32 %v2328_v10, %v2529_v25  ;;  %v2981_v40 = vmul.f32 %v418_v12, %v2550_v34  ;;  %v1475_v0 = vsel %vm1321_vm10, %v1471_v57, %v1474_v4 }
 0x160   : > { %v2948_v3 = vpop.permute.xlu0 %789  ;;  %v2950_v43 = vpop.permute.xlu1 %783  ;;  %v1477_v25 = vsel %vm1321_vm10, %v1472_v45, %v1476_v20  ;;  %v1312_v34 = vmul.f32 -1.0, %v1306_v56  ;;  %v1313_v4 = vmul.f32 -1.0, %v1307_v7 }
 0x161   : > { %4175 = vst [vmem:[#allocation41_spill] sm:$0xff] %v2948_v3  ;;  %4176 = vst [vmem:[#allocation42_spill] sm:$0xff] %v2950_v43  ;;  %v1303_v3 = vmul.f32 %v2328_v10, %v2866_v8  ;;  %v2963_v43 = vmul.f32 %v2329_v13, %v2543_v30  ;;  %v1015_v30 = vmul.f32 %v418_v12, %v2520_v16  ;;  %v1310_v16 = vmul.f32 -1.0, %v1304_v21 }
 0x162   : > { %1482 = vrot.lane.b32.xlu0 %v1472_v45, %s2403_s27  ;;  %1484 = vrot.lane.b32.xlu1 %v1473_v19, %s2403_s27  ;;  %v1305_v10 = vmul.f32 %v2329_v13, %v2877_v32  ;;  %v2994_v12 = vmul.f32 -1.0, %v2958_v39  ;;  %v3004_v57 = vmul.f32 -1.0, %v2970_v23  ;;  %v1019_v21 = vmul.f32 -2.0, %v1016_v63 }
 0x163   : > { %v1309_v28 = vmul.f32 -1.0, %v1303_v3  ;;  %v2997_v18 = vmul.f32 -1.0, %v2963_v43  ;;  %v1479_v3 = vsel %vm1321_vm10, %v1473_v19, %v1478_v60  ;;  %v3009_v56 = vmul.f32 -1.0, %v2973_v29 }
 0x164   : > { %v2975_v1 = vpop.permute.xlu0 %851  ;;  %v2977_v27 = vpop.permute.xlu1 %845  ;;  %v1325_v60 = vrot.slane %v1312_v34, 2  ;;  %v1327_v19 = vrot.slane %v1313_v4, 2  ;;  %v3021_v63 = vmul.f32 -1.0, %v2981_v40  ;;  %v1514_v34 = vmul.f32 %v2622_v6, %v2866_v8 }
 0x165   : > { %4177 = vst [vmem:[#allocation43_spill] sm:$0xff] %v2975_v1  ;;  %4178 = vst [vmem:[#allocation44_spill] sm:$0xff] %v2977_v27  ;;  %v1308_v1 = vmul.f32 %v2329_v13, %v2892_v9  ;;  %v2990_v27 = vmul.f32 -1.0, %v2955_v47  ;;  %v1018_v13 = vmul.f32 -2.0, %v1015_v30  ;;  %v3012_v7 = vrot.slane %v1309_v28, 2 }
 0x166   : > { %1486 = vrot.lane.b32.xlu0 %v1475_v0, %s2403_s27  ;;  %1488 = vrot.lane.b32.xlu1 %v1477_v25, %s2403_s27  ;;  %v1017_v0 = vmul.f32 -2.0, %v1014_v31  ;;  %v1311_v31 = vmul.f32 -1.0, %v1305_v10  ;;  %v471_v30 = vsel %vm470_vm7, %v2584_v49, %v2582_v48  ;;  %v1424_v49 = vrot.slane %v2919_v38, 2 }
 0x167   : > { %4181 = vst [vmem:[#allocation47_spill] sm:$0xff] %v3012_v7  ;;  %v1314_v25 = vmul.f32 -1.0, %v1308_v1  ;;  %v1423_v1 = vrot.slane %v2914_v44, 2  ;;  %v3030_v10 = vrot.slane %v1018_v13, 1  ;;  %v3036_v4 = vrot.slane %v1019_v21, 1 }
 0x168   : > { %v2999_v20 = vpop.permute.xlu0 %599  ;;  %v3001_v45 = vpop.permute.xlu1 %593  ;;  %v3023_v36 = vrot.slane %v1017_v0, 1  ;;  %v3039_v0 = vadd.f32 %v471_v30, %v2990_v27  ;;  %v472_v38 = vsel %vm470_vm7, %v2582_v48, %v2586_v50  ;;  %v473_v8 = vsel %vm470_vm7, %v2590_v52, %v2588_v51 }
 0x169   : > { %4179 = vst [vmem:[#allocation45_spill] sm:$0xff] %v2999_v20  ;;  %4180 = vst [vmem:[#allocation46_spill] sm:$0xff] %v3001_v45  ;;  %v3018_v45 = vrot.slane %v1310_v16, 2  ;;  %v1425_v16 = vrot.slane %v2923_v24, 2  ;;  %v3043_v20 = vrot.slane %v1311_v31, 2  ;;  %v1329_v44 = vrot.slane %v1314_v25, 2 }
 0x16a   : > { %1490 = vrot.lane.b32.xlu0 %v1479_v3, %s2403_s27  ;;  %1431 = vrot.lane.b32.xlu1 %v1422_v2, %s2403_s27  ;;  %4183 = vst [vmem:[#allocation49_spill] sm:$0xff] %v3023_v36  ;;  %4184 = vst [vmem:[#allocation50_spill] sm:$0xff] %v3036_v4  ;;  %v1427_v36 = vrot.slane %v2928_v11, 2  ;;  %v3054_v24 = vsel %vm1321_vm10, %v3012_v7, %v1325_v60  ;;  %v474_v13 = vsel %vm470_vm7, %v2588_v51, %v2600_v58 }
 0x16b   : > { %4182 = vst [vmem:[#allocation48_spill] sm:$0xff] %v3018_v45  ;;  %4185 = vst [vmem:[#allocation51_spill] sm:$0xff] %v3043_v20  ;;  %v3058_v11 = vsel %vm1321_vm10, %v3018_v45, %v1327_v19  ;;  %v511_v48 = vsel %vm470_vm7, %v2578_v46, %v2608_v62  ;;  %v1429_v31 = vrot.slane %v2942_v37, 2  ;;  %v1515_v25 = vmul.f32 %v2873_v42, %v2703_v17 }
 0x16c   : > { %v3025_v3 = vpop.permute.xlu0 %659  ;;  %v3027_v28 = vpop.permute.xlu1 %653  ;;  %4186 = vst [vmem:[#allocation52_spill] sm:$0xff] %v3054_v24  ;;  %4187 = vst [vmem:[#allocation53_spill] sm:$0xff] %v3058_v11  ;;  %v1426_v30 = vsel %vm1321_vm10, %v1422_v2, %v1425_v16  ;;  %v3074_v60 = vmul.f32 -2.0, %v1514_v34  ;;  %v1516_v51 = vmul.f32 %v2674_v41, %v2877_v32  ;;  %v1517_v46 = vmul.f32 %v2622_v6, %v2879_v59 }
 0x16d   : > { %v3082_v19 = vadd.f32 %v2586_v50, %v2994_v12  ;;  %v1428_v37 = vsel %vm1321_vm10, %v1423_v1, %v1427_v36  ;;  %v1518_v11 = vmul.f32 %v2884_v22, %v2703_v17  ;;  %v3090_v2 = vsel %vm1321_vm10, %v3043_v20, %v1329_v44 }
 0x16e   : > { %1433 = vrot.lane.b32.xlu0 %v1423_v1, %s2403_s27  ;;  %1435 = vrot.lane.b32.xlu1 %v1424_v49, %s2403_s27  ;;  %4190 = vst [vmem:[#allocation56_spill] sm:$0xff] %v3090_v2  ;;  %v3093_v16 = vadd.f32 %v472_v38, %v3004_v57  ;;  %v3097_v6 = vadd.f32 %v2600_v58, %v2997_v18  ;;  %v1521_v44 = vmul.f32 -2.0, %v1515_v25  ;;  %v3118_v38 = vld [vmem:[#allocation2 + $0x28] sm:$0xfe]  ;;  %v3159_v2 = vld [vmem:[#allocation2 + $0x50] sm:$0x1] }
 0x16f   : > { %v3100_v50 = vadd.f32 %v473_v8, %v3009_v56  ;;  %v1519_v59 = vmul.f32 %v2674_v41, %v2892_v9  ;;  %v3106_v17 = vadd.f32 %v474_v13, %v3021_v63  ;;  %v3109_v36 = vadd.f32 %v511_v48, %v2955_v47  ;;  %4197 = vst [vmem:[#allocation63_spill] sm:$0xff] %v3159_v2 }
 0x170   : > { %v3066_v52 = vpop.permute.xlu0 %700  ;;  %v3068_v21 = vpop.permute.xlu1 %694  ;;  %4191 = vst [vmem:[#allocation57_spill] sm:$0xff] %v3097_v6  ;;  %v512_v1 = vsel %vm470_vm7, %v2608_v62, %v2592_v53  ;;  %v1430_v8 = vsel %vm1321_vm10, %v1424_v49, %v1429_v31  ;;  %v1532_v41 = vrot.slane %v3074_v60, 2  ;;  %v1522_v13 = vmul.f32 -2.0, %v1516_v51  ;;  %v3132_v49 = vld [vmem:[#allocation2 + $0x38] sm:$0xfe] }
 0x171   : > { %4188 = vst [vmem:[#allocation54_spill] sm:$0xff] %v3066_v52  ;;  %4189 = vst [vmem:[#allocation55_spill] sm:$0xff] %v3068_v21  ;;  %v513_v47 = vsel %vm470_vm7, %v2594_v54, %v2596_v55  ;;  %v1524_v62 = vmul.f32 -2.0, %v1518_v11  ;;  %v1617_v48 = vmul.f32 %v2636_v15, %v3118_v38  ;;  %v3136_v31 = vadd.f32 %v2592_v53, %v2958_v39  ;;  %v3144_v51 = vld [vmem:[#allocation2 + $0x48] sm:$0x1] }
 0x172   : > { %1437 = vrot.lane.b32.xlu0 %v1426_v30, %s2403_s27  ;;  %1439 = vrot.lane.b32.xlu1 %v1428_v37, %s2403_s27  ;;  %4192 = vst [vmem:[#allocation58_spill] sm:$0xff] %v3106_v17  ;;  %4193 = vst [vmem:[#allocation59_spill] sm:$0xff] %v3109_v36  ;;  %v1523_v30 = vmul.f32 -2.0, %v1517_v46  ;;  %v3122_v37 = vld [vmem:[#allocation2 + $0x30] sm:$0xfe]  ;;  %v514_v60 = vsel %vm470_vm7, %v2596_v55, %v2620_v5  ;;  %v1525_v54 = vmul.f32 -2.0, %v1519_v59 }
 0x173   : > { %4194 = vst [vmem:[#allocation60_spill] sm:$0xff] %v3122_v37  ;;  %v1618_v25 = vmul.f32 %v3122_v37, %v2715_v26  ;;  %v1619_v11 = vmul.f32 %v2688_v61, %v3132_v49  ;;  %4195 = vst [vmem:[#allocation61_spill] sm:$0xff] %v3144_v51  ;;  %v3147_v46 = vadd.f32 %v512_v1, %v2970_v23  ;;  %v1533_v55 = vrot.slane %v1521_v44, 2 }
 0x174   : > { %v3114_v58 = vpop.permute.xlu0 %781  ;;  %v3116_v34 = vpop.permute.xlu1 %787  ;;  %v1620_v59 = vmul.f32 %v2636_v15, %v3144_v51  ;;  %v3162_v24 = vadd.f32 %v513_v47, %v2973_v29  ;;  %v1534_v45 = vrot.slane %v1522_v13, 2  ;;  %v1535_v23 = vrot.slane %v1523_v30, 2  ;;  %v4202_v30 = vld [vmem:[#allocation12_spill] sm:$0xff]  ;;  %v4203_v47 = vld [vmem:[#allocation11_spill] sm:$0xff] }
 0x175   : > { %4196 = vst [vmem:[#allocation62_spill] sm:$0xff] %v3147_v46  ;;  %v1621_v1 = vmul.f32 %v3159_v2, %v2715_v26  ;;  %v3170_v44 = vmul.f32 2.0, %v1617_v48  ;;  %v3172_v20 = vmul.f32 2.0, %v1618_v25  ;;  %v3177_v15 = vsel %vm926_vm12, %v2760_v14, %v2771_v33 }
 0x176   : > { %1441 = vrot.lane.b32.xlu0 %v1430_v8, %s2403_s27  ;;  %1541 = vrot.lane.b32.xlu1 %v1532_v41, %s2405_s29  ;;  %v3151_v8 = vadd.f32 %v2620_v5, %v2963_v43  ;;  %4198 = vst [vmem:[#allocation64_spill] sm:$0xff] %v3162_v24  ;;  %v3167_v5 = vadd.f32 %v514_v60, %v2981_v40  ;;  %v1537_v43 = vrot.slane %v1524_v62, 2  ;;  %4200 = vst [vmem:[#allocation66_spill] sm:$0xff] %v3177_v15 }
 0x177   : > { %v1539_v29 = vrot.slane %v1525_v54, 2  ;;  %v1575_v26 = vmul.f32 -4.0, %v2873_v42  ;;  %v3181_v13 = vmul.f32 2.0, %v1619_v11  ;;  %v3186_v40 = vsel %vm926_vm12, %v2771_v33, %v2773_v35  ;;  %v3198_v42 = vld [vmem:[#allocation2 + $0x58] sm:$0x1] }
 0x178   : > { %v3153_v53 = vpop.permute.xlu0 %843  ;;  %v3155_v39 = vpop.permute.xlu1 %849  ;;  %4199 = vst [vmem:[#allocation65_spill] sm:$0xff] %v3167_v5  ;;  %4201 = vst [vmem:[#allocation67_spill] sm:$0xff] %v3186_v40  ;;  %v3191_v62 = vsel %vm926_vm12, %v4203_v47, %v4202_v30  ;;  %v1577_v54 = vmul.f32 -4.0, %v2884_v22  ;;  %v1626_v52 = vmul.f32 2.0, %v1620_v59  ;;  %v1536_v5 = vsel %vm1321_vm10, %v1532_v41, %v1535_v23 }
 0x179   : > { %4204 = vst [vmem:[#allocation68_spill] sm:$0xff] %v3191_v62  ;;  %4207 = vst [vmem:[#allocation71_spill] sm:$0xff] %v3198_v42  ;;  %v1627_v36 = vmul.f32 2.0, %v1621_v1  ;;  %v1622_v33 = vmul.f32 %v2688_v61, %v3198_v42  ;;  %v3203_v35 = vmul.f32 -2.0, %v1617_v48  ;;  %v1538_v24 = vsel %vm1321_vm10, %v1533_v55, %v1537_v43 }
 0x17a   : > { %1543 = vrot.lane.b32.xlu0 %v1533_v55, %s2405_s29  ;;  %1545 = vrot.lane.b32.xlu1 %v1534_v45, %s2405_s29  ;;  %v1576_v21 = vmul.f32 -4.0, %v2877_v32  ;;  %v1540_v41 = vsel %vm1321_vm10, %v1534_v45, %v1539_v29  ;;  %v1583_v23 = vrot.slane %v1575_v26, 2  ;;  %v1578_v62 = vmul.f32 -4.0, %v2892_v9  ;;  %v4210_v26 = vld [vmem:[#allocation3_spill] sm:$0xff] }
 0x17b   : > { %v1585_v55 = vrot.slane %v1577_v54, 2  ;;  %v1638_v43 = vrot.slane %v1626_v52, 2  ;;  %v3218_v32 = vmul.f32 -2.0, %v1618_v25  ;;  %v1640_v22 = vrot.slane %v1627_v36, 2 }
 0x17c   : > { %v3193_v60 = vpop.permute.xlu0 %924  ;;  %v3195_v7 = vpop.permute.xlu1 %730  ;;  %v1628_v46 = vmul.f32 2.0, %v1622_v33  ;;  %v1675_v45 = vmul.f32 -2.0, %v1620_v59  ;;  %v1584_v9 = vrot.slane %v1576_v21, 2  ;;  %v1676_v29 = vmul.f32 -2.0, %v1621_v1 }
 0x17d   : > { %4205 = vst [vmem:[#allocation69_spill] sm:$0xff] %v3193_v60  ;;  %4206 = vst [vmem:[#allocation70_spill] sm:$0xff] %v3195_v7  ;;  %v1635_v7 = vrot.slane %v3170_v44, 2  ;;  %v3220_v44 = vmul.f32 -2.0, %v1619_v11  ;;  %v3226_v61 = vmul.f32 %v4210_v26, %v3118_v38  ;;  %v1724_v52 = vmul.f32 %v4210_v26, %v3144_v51  ;;  %v4211_v11 = vld [vmem:[#allocation5_spill] sm:$0xff] }
 0x17e   : > { %1547 = vrot.lane.b32.xlu0 %v1536_v5, %s2405_s29  ;;  %1549 = vrot.lane.b32.xlu1 %v1538_v24, %s2405_s29  ;;  %v1587_v25 = vrot.slane %v1578_v62, 2  ;;  %v1677_v36 = vmul.f32 -2.0, %v1622_v33  ;;  %v3233_v54 = vmul.f32 %v3122_v37, %v4211_v11  ;;  %v1725_v21 = vmul.f32 %v3159_v2, %v4211_v11  ;;  %v4212_v24 = vld [vmem:[#allocation4_spill] sm:$0xff] }
 0x17f   : > { %v1726_v62 = vmul.f32 %v4212_v24, %v3198_v42  ;;  %v3250_v33 = vsel %vm1321_vm10, %v1635_v7, %v1638_v43  ;;  %v4213_v11 = vrot.slane %v3172_v20, 2  ;;  %v1642_v40 = vrot.slane %v1628_v46, 2 }
 0x180   : > { %v3214_v48 = vpop.permute.xlu0 %732  ;;  %v3216_v5 = vpop.permute.xlu1 %734  ;;  %v1689_v26 = vrot.slane %v1676_v29, 2  ;;  %v3260_v15 = vmul.f32 -1.0, %v3226_v61  ;;  %v1730_v30 = vmul.f32 -1.0, %v1724_v52  ;;  %v1588_v43 = vsel %vm1321_vm10, %v1584_v9, %v1587_v25 }
 0x181   : > { %4208 = vst [vmem:[#allocation72_spill] sm:$0xff] %v3214_v48  ;;  %4209 = vst [vmem:[#allocation73_spill] sm:$0xff] %v3216_v5  ;;  %v3245_v5 = vmul.f32 %v4212_v24, %v3132_v49  ;;  %v3255_v48 = vsel %vm1321_vm10, %v4213_v11, %v1640_v22  ;;  %v1691_v24 = vrot.slane %v1677_v36, 2  ;;  %v3265_v60 = vmul.f32 -1.0, %v3233_v54 }
 0x182   : > { %1551 = vrot.lane.b32.xlu0 %v1540_v41, %s2405_s29  ;;  %1589 = vrot.lane.b32.xlu1 %v1583_v23, %s2397_s14  ;;  %v1586_v41 = vsel %vm1321_vm10, %v1583_v23, %v1585_v55  ;;  %v1687_v55 = vrot.slane %v1675_v45, 2  ;;  %4214 = vst [vmem:[#allocation3_spill] sm:$0xff] %v3260_v15  ;;  %v1731_v22 = vmul.f32 -1.0, %v1725_v21  ;;  %v1785_v29 = vrot.slane %v1724_v52, 2 }
 0x183   : > { %4215 = vst [vmem:[#allocation5_spill] sm:$0xff] %v3265_v60  ;;  %v3273_v23 = vmul.f32 -1.0, %v3245_v5  ;;  %v1732_v47 = vmul.f32 -1.0, %v1726_v62  ;;  %v1787_v25 = vrot.slane %v1725_v21, 2  ;;  %v1789_v36 = vrot.slane %v1726_v62, 2 }
 0x184   : > { %v3237_v59 = vpop.permute.xlu0 %970  ;;  %v3239_v1 = vpop.permute.xlu1 %972  ;;  %v4217_v14 = vrot.slane %v3181_v13, 2  ;;  %v4218_v45 = vrot.slane %v3203_v35, 2  ;;  %v1742_v6 = vrot.slane %v1730_v30, 2  ;;  %v4219_v21 = vrot.slane %v3218_v32, 2 }
 0x185   : > { %4216 = vst [vmem:[#allocation4_spill] sm:$0xff] %v3273_v23  ;;  %v1829_v17 = vmul.f32 2.0, %v3159_v2  ;;  %v4232_v2 = vld [vmem:[#allocation32_spill] sm:$0xff] }
 0x186   : > { %1591 = vrot.lane.b32.xlu0 %v1584_v9, %s2397_s14  ;;  %1593 = vrot.lane.b32.xlu1 %v1586_v41, %s2397_s14  ;;  %v4108_v41 = vrot.slane %v3233_v54, 2  ;;  %v3281_v4 = vsel %vm1321_vm10, %v4217_v14, %v1642_v40  ;;  %v3286_v52 = vsel %vm1321_vm10, %v4218_v45, %v1687_v55  ;;  %v3293_v62 = vsel %vm1321_vm10, %v4219_v21, %v1689_v26 }
 0x187   : > { %v1744_v9 = vrot.slane %v1731_v22, 2  ;;  %v1746_v21 = vrot.slane %v1732_v47, 2  ;;  %v4222_v22 = vrot.slane %v3245_v5, 2  ;;  %v1828_v40 = vmul.f32 2.0, %v3144_v51 }
 0x188   : > { %v3267_v46 = vpop.permute.xlu0 %974  ;;  %v3269_v11 = vpop.permute.xlu1 %976  ;;  %v4227_v47 = vrot.slane %v3172_v20, 2  ;;  %v4234_v20 = vrot.slane %v3181_v13, 2 }
 0x18a   : > { %1595 = vrot.lane.b32.xlu0 %v1588_v43, %s2397_s14  ;;  %1644 = vrot.lane.b32.xlu1 %v1635_v7, %s2406_s30  ;;  %v4220_v43 = vrot.slane %v3220_v44, 2  ;;  %v4221_v7 = vrot.slane %v3226_v61, 2 }
 0x18c   : > { %v3298_v14 = vsel %vm1321_vm10, %v4220_v43, %v1691_v24  ;;  %v3301_v55 = vpop.permute.xlu0 %978  ;;  %v3303_v45 = vpop.permute.xlu1 %980  ;;  %v3308_v30 = vsel %vm1321_vm10, %v4221_v7, %v1785_v29  ;;  %v3314_v24 = vsel %vm1321_vm10, %v4108_v41, %v1787_v25  ;;  %v3319_v43 = vsel %vm1321_vm10, %v4222_v22, %v1789_v36  ;;  %v4224_v29 = vld [vmem:[#allocation31_spill] sm:$0xff]  ;;  %v4225_v7 = vld [vmem:[#allocation13_spill] sm:$0xff] }
 0x18d   : > { %4223 = vst [vmem:[#allocation74_spill] sm:$0xff] %v3319_v43  ;;  %v3326_v26 = vsel %vm562_vm13, %v4225_v7, %v4224_v29  ;;  %v4228_v25 = vrot.slane %v3260_v15, 2  ;;  %v1830_v36 = vmul.f32 2.0, %v3198_v42  ;;  %v4230_v22 = vld [vmem:[#allocation7_spill] sm:$0xff]  ;;  %v4233_v43 = vld [vmem:[#allocation14_spill] sm:$0xff]  ;;  %v1842_v15 = vrot.slane %v1829_v17, 2 }
 0x18e   : > { %4226 = vst [vmem:[#allocation31_spill] sm:$0xff] %v3326_v26  ;;  %1646 = vrot.lane.b32.xlu0 %v4227_v47, %s2406_s30  ;;  %v3339_v51 = vmul.f32 %v4230_v22, %v3118_v38  ;;  %v3344_v7 = vsel %vm562_vm13, %v4233_v43, %v4232_v2  ;;  %1648 = vrot.lane.b32.xlu1 %v4234_v20, %s2406_s30  ;;  %v4235_v47 = vrot.slane %v3265_v60, 2  ;;  %v3358_v22 = vmul.f32 2.0, %v3122_v37 }
 0x18f   : > { %v3334_v41 = vsel %vm1321_vm10, %v4228_v25, %v1742_v6  ;;  %v3355_v25 = vmul.f32 2.0, %v3118_v38  ;;  %v4241_v20 = vrot.slane %v3273_v23, 2  ;;  %v1840_v60 = vrot.slane %v1828_v40, 2  ;;  %v4245_v23 = vld [vmem:[#allocation18_spill] sm:$0xff] }
 0x190   : > { %4229 = vst [vmem:[#allocation13_spill] sm:$0xff] %v3334_v41  ;;  %4231 = vst [vmem:[#allocation75_spill] sm:$0xff] %v3339_v51  ;;  %v3352_v6 = vsel %vm1321_vm10, %v4235_v47, %v1744_v9  ;;  %v4239_v51 = vld [vmem:[#allocation21_spill] sm:$0xff]  ;;  %v3363_v42 = vpop.permute.xlu0 %1050  ;;  %v3365_v13 = vpop.permute.xlu1 %1052  ;;  %v3373_v47 = vmul.f32 2.0, %v3132_v49  ;;  %v4244_v41 = vld [vmem:[#allocation22_spill] sm:$0xff] }
 0x191   : > { %4236 = vst [vmem:[#allocation32_spill] sm:$0xff] %v3352_v6  ;;  %4237 = vst [vmem:[#allocation14_spill] sm:$0xff] %v3355_v25  ;;  %v666_v43 = vsel %vm663_vm14, %v4239_v51, %v3025_v3  ;;  %v3370_v9 = vsel %vm1321_vm10, %v4241_v20, %v1746_v21  ;;  %v576_v6 = vadd.f32 %v3326_v26, %v3009_v56  ;;  %v1844_v20 = vrot.slane %v1830_v36, 2  ;;  %v4247_v56 = vld [vmem:[#allocation17_spill] sm:$0xff] }
 0x192   : > { %4238 = vst [vmem:[#allocation76_spill] sm:$0xff] %v3358_v22  ;;  %4240 = vst [vmem:[#allocation21_spill] sm:$0xff] %v3363_v42  ;;  %v664_v51 = vsel %vm663_vm14, %v4244_v41, %v3027_v28  ;;  %v573_v42 = vadd.f32 %v3344_v7, %v2990_v27  ;;  %v575_v21 = vadd.f32 %v4245_v23, %v2994_v12  ;;  %1650 = vrot.lane.b32.xlu0 %v3250_v33, %s2406_s30 }
 0x193   : > { %4242 = vst [vmem:[#allocation77_spill] sm:$0xff] %v3370_v9  ;;  %4243 = vst [vmem:[#allocation78_spill] sm:$0xff] %v3373_v47  ;;  %v3387_v9 = vmul.f32 -2.0, %v3118_v38  ;;  %v578_v26 = vadd.f32 %v4247_v56, %v2997_v18  ;;  %v677_v41 = vadd.f32 %v666_v43, %v576_v6  ;;  %1652 = vrot.lane.b32.xlu1 %v3255_v48, %s2406_s30  ;;  %v4122_v17 = vrot.slane %v3355_v25, 2  ;;  %v4252_v6 = vld [vmem:[#allocation37_spill] sm:$0xff] }
 0x194   : > { %v4121_v27 = vrot.slane %v3358_v22, 2  ;;  %v3398_v12 = vsel %vm562_vm13, %v4224_v29, %v4247_v56  ;;  %v3403_v38 = vsel %vm562_vm13, %v4232_v2, %v4245_v23  ;;  %v674_v33 = vadd.f32 %v664_v51, %v573_v42  ;;  %v3405_v18 = vpop.permute.xlu0 %1054  ;;  %v3407_v40 = vpop.permute.xlu1 %1079  ;;  %v4256_v51 = vld [vmem:[#allocation26_spill] sm:$0xff] }
 0x195   : > { %4246 = vst [vmem:[#allocation22_spill] sm:$0xff] %v3387_v9  ;;  %v4120_v48 = vrot.slane %v3373_v47, 2  ;;  %v3412_v36 = vadd.f32 %v4245_v23, %v3136_v31  ;;  %v3416_v29 = vadd.f32 %v4247_v56, %v3151_v8  ;;  %v3421_v2 = vsel %vm1321_vm10, %v4122_v17, %v1840_v60  ;;  %v4258_v8 = vld [vmem:[#allocation33_spill] sm:$0xff]  ;;  %v4260_v17 = vld [vmem:[#allocation27_spill] sm:$0xff]  ;;  %v4264_v9 = vld [vmem:[#allocation16_spill] sm:$0xff] }
 0x196   : > { %4250 = vst [vmem:[#allocation79_spill] sm:$0xff] %v3421_v2  ;;  %v3426_v42 = vsel %vm1321_vm10, %v4121_v27, %v1842_v15  ;;  %v665_v43 = vsel %vm663_vm14, %v3027_v28, %v4252_v6  ;;  %1654 = vrot.lane.b32.xlu0 %v3281_v4, %s2406_s30  ;;  %v3440_v60 = vmul.f32 -2.0, %v3122_v37  ;;  %v577_v15 = vadd.f32 %v3398_v12, %v3021_v63  ;;  %v4255_v28 = vld [vmem:[#allocation38_spill] sm:$0xff]  ;;  %v4267_v47 = vld [vmem:[#allocation29_spill] sm:$0xff] }
 0x197   : > { %4248 = vst [vmem:[#allocation18_spill] sm:$0xff] %v3412_v36  ;;  %4249 = vst [vmem:[#allocation17_spill] sm:$0xff] %v3416_v29  ;;  %v3436_v31 = vsel %vm1321_vm10, %v4120_v48, %v1844_v20  ;;  %v574_v23 = vadd.f32 %v3403_v38, %v3004_v57  ;;  %v667_v4 = vsel %vm663_vm14, %v3025_v3, %v4255_v28  ;;  %v4257_v20 = vrot.slane %v3203_v35, 2  ;;  %v4259_v48 = vld [vmem:[#allocation15_spill] sm:$0xff]  ;;  %v4261_v57 = vld [vmem:[#allocation25_spill] sm:$0xff] }
 0x198   : > { %4251 = vst [vmem:[#allocation80_spill] sm:$0xff] %v3426_v42  ;;  %4253 = vst [vmem:[#allocation37_spill] sm:$0xff] %v3436_v31  ;;  %v805_v56 = vadd.f32 %v4256_v51, %v677_v41  ;;  %v3456_v27 = vsel %vm853_vm15, %v4259_v48, %v4258_v8  ;;  %v3461_v63 = vsel %vm853_vm15, %v4258_v8, %v4260_v17  ;;  %v1082_v41 = vpop.permute.xlu0 %1081  ;;  %v3469_v35 = vpop.permute.xlu1 %1083  ;;  %v4268_v22 = vrot.slane %v3218_v32, 2  ;;  %v4271_v36 = vld [vmem:[#allocation30_spill] sm:$0xff] }
 0x199   : > { %4254 = vst [vmem:[#allocation81_spill] sm:$0xff] %v3440_v60  ;;  %1693 = vrot.lane.b32.xlu1 %v4257_v20, %s2406_s30  ;;  %v802_v37 = vadd.f32 %v4261_v57, %v674_v33  ;;  %v3467_v3 = vsel %vm791_vm0, %v4261_v57, %v3114_v58  ;;  %v4263_v20 = vld [vmem:[#allocation34_spill] sm:$0xff]  ;;  %v4265_v60 = vld [vmem:[#allocation35_spill] sm:$0xff]  ;;  %v675_v17 = vadd.f32 %v665_v43, %v574_v23 }
 0x19a   : > { %4262 = vst [vmem:[#allocation38_spill] sm:$0xff] %v3467_v3  ;;  %v3474_v31 = vsel %vm853_vm15, %v4264_v9, %v4263_v20  ;;  %v3478_v42 = vadd.f32 %v4265_v60, %v3082_v19  ;;  %v3483_v33 = vsel %vm791_vm0, %v4256_v51, %v3116_v34  ;;  %v676_v8 = vadd.f32 %v4252_v6, %v575_v21  ;;  %v4269_v19 = vld [vmem:[#allocation45_spill] sm:$0xff]  ;;  %v4270_v43 = vld [vmem:[#allocation19_spill] sm:$0xff]  ;;  %v4273_v32 = vld [vmem:[#allocation42_spill] sm:$0xff] }
 0x19b   : > { %4266 = vst [vmem:[#allocation33_spill] sm:$0xff] %v3483_v33  ;;  %v679_v57 = vadd.f32 %v4255_v28, %v578_v26  ;;  %v678_v2 = vadd.f32 %v667_v4, %v577_v15  ;;  %v854_v29 = vsel %vm853_vm15, %v4267_v47, %v3153_v53  ;;  %1695 = vrot.lane.b32.xlu0 %v4268_v22, %s2406_s30  ;;  %v4272_v21 = vrot.slane %v3220_v44, 2  ;;  %v4274_v44 = vld [vmem:[#allocation46_spill] sm:$0xff] }
 0x19c   : > { %v605_v23 = vsel %vm562_vm13, %v4270_v43, %v4269_v19  ;;  %v867_v51 = vadd.f32 %v4271_v36, %v805_v56  ;;  %v803_v25 = vadd.f32 %v3467_v3, %v675_v17  ;;  %v856_v26 = vsel %vm853_vm15, %v4271_v36, %v3155_v39  ;;  %v3516_v4 = vpop.permute.xlu0 %1105  ;;  %v3518_v36 = vpop.permute.xlu1 %1107  ;;  %v4275_v56 = vld [vmem:[#allocation20_spill] sm:$0xff] }
 0x19d   : > { %1697 = vrot.lane.b32.xlu1 %v4272_v21, %s2406_s30  ;;  %v864_v6 = vadd.f32 %v4267_v47, %v802_v37  ;;  %v3508_v22 = vsel %vm791_vm0, %v3114_v58, %v4273_v32  ;;  %v806_v15 = vadd.f32 %v3483_v33, %v678_v2  ;;  %v3514_v28 = vsel %vm982_vm1, %v3237_v59, %v3239_v1  ;;  %v4276_v47 = vld [vmem:[#allocation41_spill] sm:$0xff]  ;;  %v4277_v43 = vld [vmem:[#allocation44_spill] sm:$0xff] }
 0x19e   : > { %v603_v37 = vsel %vm562_vm13, %v4275_v56, %v4274_v44  ;;  %v3526_v58 = vsel %vm791_vm0, %v3116_v34, %v4276_v47  ;;  %v865_v17 = vadd.f32 %v854_v29, %v803_v25  ;;  %v3531_v2 = vsel %vm982_vm1, %v3269_v11, %v3301_v55  ;;  %v4278_v34 = vld [vmem:[#allocation36_spill] sm:$0xff]  ;;  %v4279_v47 = vld [vmem:[#allocation43_spill] sm:$0xff] }
 0x19f   : > { %v855_v21 = vsel %vm853_vm15, %v3153_v53, %v4277_v43  ;;  %v868_v32 = vadd.f32 %v856_v26, %v806_v15  ;;  %v993_v33 = vadd.f32 %v3237_v59, %v864_v6  ;;  %v996_v56 = vadd.f32 %v3269_v11, %v867_v51  ;;  %1699 = vrot.lane.b32.xlu0 %v3286_v52, %s2406_s30 }
 0x1a0   : > { %v606_v25 = vsel %vm562_vm13, %v4269_v19, %v4278_v34  ;;  %v804_v29 = vadd.f32 %v3508_v22, %v676_v8  ;;  %v857_v3 = vsel %vm853_vm15, %v3155_v39, %v4279_v47  ;;  %v994_v53 = vadd.f32 %v3514_v28, %v865_v17  ;;  %v3560_v26 = vpop.permute.xlu0 %1109  ;;  %v1135_v39 = vpop.permute.xlu1 %1134 }
 0x1a1   : > { %1701 = vrot.lane.b32.xlu1 %v3293_v62, %s2406_s30  ;;  %v604_v51 = vsel %vm562_vm13, %v4274_v44, %v4265_v60  ;;  %v807_v52 = vadd.f32 %v3526_v58, %v679_v57  ;;  %v3557_v19 = vsel %vm982_vm1, %v3239_v1, %v3267_v46  ;;  %v997_v8 = vadd.f32 %v3531_v2, %v868_v32  ;;  %v4281_v46 = vld [vmem:[#allocation49_spill] sm:$0xff] }
 0x1a2   : > { %v613_v6 = vadd.f32 %v603_v37, %v3039_v0  ;;  %v866_v15 = vadd.f32 %v855_v21, %v804_v29  ;;  %v3566_v62 = vsel %vm982_vm1, %v3301_v55, %v3303_v45  ;;  %v1085_v60 = vsel %vm562_vm13, %v3407_v40, %v1082_v41 }
 0x1a3   : > { %4280 = vst [vmem:[#allocation15_spill] sm:$0xff] %v3566_v62  ;;  %v616_v57 = vadd.f32 %v605_v23, %v3100_v50  ;;  %v869_v1 = vadd.f32 %v857_v3, %v807_v52  ;;  %v1029_v44 = vadd.f32 %v4281_v46, %v993_v33  ;;  %v1032_v17 = vadd.f32 %v4281_v46, %v996_v56 }
 0x1a4   : > { %1703 = vrot.lane.b32.xlu0 %v3298_v14, %s2406_s30  ;;  %v614_v0 = vadd.f32 %v604_v51, %v3093_v16  ;;  %v1030_v37 = vadd.f32 %v3030_v10, %v994_v53  ;;  %v995_v55 = vadd.f32 %v3557_v19, %v866_v15  ;;  %v1086_v45 = vsel %vm562_vm13, %v1082_v41, %v3469_v35  ;;  %v1137_v14 = vpop.permute.xlu0 %1136  ;;  %v1139_v43 = vpop.permute.xlu1 %1138  ;;  %v4283_v16 = vld [vmem:[#allocation57_spill] sm:$0xff] }
 0x1a5   : > { %v4282_v50 = vrot.slane %v3226_v61, 2  ;;  %v1033_v40 = vadd.f32 %v3030_v10, %v997_v8  ;;  %v998_v3 = vadd.f32 %v3566_v62, %v869_v1  ;;  %v1090_v33 = vadd.f32 %v1085_v60, %v1029_v44  ;;  %v4285_v8 = vld [vmem:[#allocation58_spill] sm:$0xff] }
 0x1a6   : > { %v1093_v23 = vadd.f32 %v1085_v60, %v1032_v17  ;;  %v618_v21 = vadd.f32 %v4278_v34, %v4283_v16  ;;  %v898_v32 = vadd.f32 %v4259_v48, %v613_v6  ;;  %v1140_v56 = vsel %vm663_vm14, %v1135_v39, %v1137_v14  ;;  %v4287_v60 = vld [vmem:[#allocation50_spill] sm:$0xff]  ;;  %v4290_v16 = vld [vmem:[#allocation11_spill] sm:$0xff] }
 0x1a7   : > { %1791 = vrot.lane.b32.xlu1 %v4282_v50, %s2404_s28  ;;  %v1141_v41 = vsel %vm663_vm14, %v1137_v14, %v1139_v43  ;;  %v1145_v29 = vadd.f32 %v1140_v56, %v1090_v33  ;;  %v1091_v47 = vadd.f32 %v1086_v45, %v1030_v37  ;;  %v1094_v53 = vadd.f32 %v1086_v45, %v1033_v40  ;;  %v4288_v50 = vld [vmem:[#allocation10_spill] sm:$0xff] }
 0x1a8   : > { %v1148_v61 = vadd.f32 %v1140_v56, %v1093_v23  ;;  %v4284_v51 = vrot.slane %v3233_v54, 2  ;;  %v900_v52 = vadd.f32 %v3461_v63, %v3478_v42  ;;  %v617_v15 = vadd.f32 %v606_v25, %v4285_v8  ;;  %v1165_v37 = vpop.permute.xlu0 %1164  ;;  %v1167_v45 = vpop.permute.xlu1 %1166  ;;  %v4291_v56 = vld [vmem:[#allocation69_spill] sm:$0xff] }
 0x1a9   : > { %v901_v34 = vadd.f32 %v4264_v9, %v616_v57  ;;  %v899_v6 = vadd.f32 %v3456_v27, %v614_v0  ;;  %v4286_v39 = vrot.slane %v3245_v5, 2  ;;  %v1031_v1 = vadd.f32 %v4287_v60, %v995_v55  ;;  %v4289_v55 = vld [vmem:[#allocation28_spill] sm:$0xff] }
 0x1aa   : > { %1793 = vrot.lane.b32.xlu0 %v4284_v51, %s2404_s28  ;;  %v1034_v44 = vadd.f32 %v4287_v60, %v998_v3  ;;  %v1146_v17 = vadd.f32 %v1141_v41, %v1091_v47  ;;  %v1149_v54 = vadd.f32 %v1141_v41, %v1094_v53  ;;  %v937_v42 = vadd.f32 %v4288_v50, %v898_v32  ;;  %v4292_v41 = vld [vmem:[#allocation12_spill] sm:$0xff]  ;;  %v4293_v51 = vld [vmem:[#allocation66_spill] sm:$0xff] }
 0x1ab   : > { %1795 = vrot.lane.b32.xlu1 %v4286_v39, %s2404_s28  ;;  %v1175_v40 = vadd.f32 %v1165_v37, %v1145_v29  ;;  %v1178_v25 = vadd.f32 %v1165_v37, %v1148_v61  ;;  %v1170_v57 = vsel %vm791_vm0, %v1165_v37, %v1167_v45  ;;  %v1092_v0 = vadd.f32 %v3469_v35, %v1031_v1 }
 0x1ac   : > { %v1095_v33 = vadd.f32 %v3469_v35, %v1034_v44  ;;  %v1176_v5 = vadd.f32 %v1170_v57, %v1146_v17  ;;  %v1179_v23 = vadd.f32 %v1170_v57, %v1149_v54  ;;  %v3612_v3 = vsel %vm853_vm15, %v4263_v20, %v4289_v55  ;;  %v1169_v20 = vpop.permute.xlu0 %1168  ;;  %v1220_v53 = vpop.permute.xlu1 %1219  ;;  %v4295_v54 = vld [vmem:[#allocation74_spill] sm:$0xff] }
 0x1ad   : > { %v902_v14 = vadd.f32 %v3474_v31, %v617_v15  ;;  %v940_v32 = vadd.f32 %v4290_v16, %v901_v34  ;;  %v3619_v29 = vsel %vm926_vm12, %v4292_v41, %v4291_v56  ;;  %v903_v35 = vadd.f32 %v3612_v3, %v618_v21 }
 0x1ae   : > { %1797 = vrot.lane.b32.xlu0 %v3308_v30, %s2404_s28  ;;  %v999_v30 = vadd.f32 %v3237_v59, %v937_v42  ;;  %v1147_v61 = vadd.f32 %v1139_v43, %v1092_v0  ;;  %v1150_v47 = vadd.f32 %v1139_v43, %v1095_v33  ;;  %v938_v8 = vadd.f32 %v4293_v51, %v899_v6  ;;  %v4296_v43 = vld [vmem:[#allocation62_spill] sm:$0xff]  ;;  %v4297_v42 = vld [vmem:[#allocation68_spill] sm:$0xff]  ;;  %v4299_v33 = vld [vmem:[#allocation3_spill] sm:$0xff] }
 0x1af   : > { %1799 = vrot.lane.b32.xlu1 %v3314_v24, %s2404_s28  ;;  %v1002_v15 = vadd.f32 %v3269_v11, %v940_v32  ;;  %v1171_v34 = vsel %vm791_vm0, %v1167_v45, %v1169_v20  ;;  %v3629_v39 = vmul.f32 -2.0, %v3132_v49  ;;  %v942_v1 = vadd.f32 %v3619_v29, %v903_v35  ;;  %v4294_v24 = vld [vmem:[#allocation67_spill] sm:$0xff]  ;;  %v4298_v45 = vld [vmem:[#allocation21_spill] sm:$0xff] }
 0x1b0   : > { %v939_v44 = vadd.f32 %v4294_v24, %v900_v52  ;;  %v1177_v21 = vadd.f32 %v1171_v34, %v1147_v61  ;;  %v1180_v17 = vadd.f32 %v1171_v34, %v1150_v47  ;;  %v620_v37 = vadd.f32 %v3403_v38, %v4296_v43  ;;  %v4301_v52 = vld [vmem:[#allocation39_spill] sm:$0xff]  ;;  %v1222_v61 = vpop.permute.xlu0 %1221 }
 0x1b1   : > { %v1000_v6 = vadd.f32 %v3514_v28, %v938_v8  ;;  %v941_v57 = vadd.f32 %v4297_v42, %v902_v14  ;;  %v1056_v0 = vsel %vm470_vm7, %v4298_v45, %v3365_v13  ;;  %v4300_v55 = vrot.slane %v4299_v33, 2  ;;  %v4302_v32 = vld [vmem:[#allocation55_spill] sm:$0xff]  ;;  %v1224_v14 = vpop.permute.xlu1 %1223 }
 0x1b2   : > { %1801 = vrot.lane.b32.xlu0 %v4295_v54, %s2404_s28  ;;  %v705_v56 = vsel %vm663_vm14, %v4302_v32, %v4301_v52  ;;  %v1001_v41 = vadd.f32 %v3557_v19, %v939_v44  ;;  %v1004_v38 = vadd.f32 %v3566_v62, %v942_v1  ;;  %v1035_v35 = vadd.f32 %v4281_v46, %v999_v30  ;;  %v4303_v54 = vld [vmem:[#allocation64_spill] sm:$0xff]  ;;  %v4304_v43 = vld [vmem:[#allocation31_spill] sm:$0xff] }
 0x1b3   : > { %1748 = vrot.lane.b32.xlu1 %v4300_v55, %s2404_s28  ;;  %v1038_v47 = vadd.f32 %v4281_v46, %v1002_v15  ;;  %v1111_v20 = vsel %vm562_vm13, %v3516_v4, %v3518_v36  ;;  %v1225_v8 = vsel %vm853_vm15, %v1220_v53, %v1222_v61  ;;  %v1226_v34 = vsel %vm853_vm15, %v1222_v61, %v1224_v14  ;;  %v4305_v44 = vld [vmem:[#allocation59_spill] sm:$0xff]  ;;  %v4306_v46 = vld [vmem:[#allocation5_spill] sm:$0xff]  ;;  %v4308_v4 = vld [vmem:[#allocation24_spill] sm:$0xff] }
 0x1b4   : > { %v3659_v45 = vadd.f32 %v4304_v43, %v4303_v54  ;;  %v619_v1 = vadd.f32 %v3344_v7, %v4305_v44  ;;  %v1003_v30 = vadd.f32 %v3531_v2, %v941_v57  ;;  %v1061_v33 = vadd.f32 %v1056_v0, %v1035_v35  ;;  %v4309_v54 = vld [vmem:[#allocation4_spill] sm:$0xff] }
 0x1b5   : > { %v4307_v15 = vrot.slane %v4306_v46, 2  ;;  %v704_v55 = vsel %vm663_vm14, %v4308_v4, %v4302_v32  ;;  %v715_v62 = vadd.f32 %v705_v56, %v620_v37  ;;  %v1036_v61 = vadd.f32 %v3030_v10, %v1000_v6  ;;  %v1194_v46 = vpop.permute.xlu0 %1193 }
 0x1b6   : > { %v1064_v14 = vadd.f32 %v1056_v0, %v1038_v47  ;;  %v4310_v43 = vrot.slane %v4309_v54, 2  ;;  %v1037_v7 = vadd.f32 %v4287_v60, %v1001_v41  ;;  %v1040_v57 = vadd.f32 %v4287_v60, %v1004_v38  ;;  %v4311_v60 = vld [vmem:[#allocation13_spill] sm:$0xff] }
 0x1b7   : > { %1750 = vrot.lane.b32.xlu0 %v4307_v15, %s2404_s28  ;;  %v1057_v35 = vsel %vm470_vm7, %v3365_v13, %v3405_v18  ;;  %v1116_v44 = vadd.f32 %v1111_v20, %v1061_v33  ;;  %v1196_v15 = vpop.permute.xlu1 %1195  ;;  %v1204_v37 = vadd.f32 %v1194_v46, %v1175_v40  ;;  %v1207_v56 = vadd.f32 %v1194_v46, %v1178_v25  ;;  %v4312_v25 = vld [vmem:[#allocation32_spill] sm:$0xff] }
 0x1b8   : > { %1752 = vrot.lane.b32.xlu1 %v4310_v43, %s2404_s28  ;;  %v1119_v32 = vadd.f32 %v1111_v20, %v1064_v14  ;;  %v1199_v6 = vsel %vm853_vm15, %v1194_v46, %v1196_v15  ;;  %v1039_v0 = vadd.f32 %v3030_v10, %v1003_v30  ;;  %v1063_v47 = vadd.f32 %v3405_v18, %v1037_v7  ;;  %v4313_v10 = vld [vmem:[#allocation70_spill] sm:$0xff]  ;;  %v4314_v20 = vld [vmem:[#allocation9_spill] sm:$0xff] }
 0x1b9   : > { %v3682_v4 = vadd.f32 %v1199_v6, %v1176_v5  ;;  %v3684_v41 = vadd.f32 %v1199_v6, %v1179_v23  ;;  %v1066_v13 = vadd.f32 %v3405_v18, %v1040_v57  ;;  %v1230_v38 = vadd.f32 %v1220_v53, %v1116_v44  ;;  %v1198_v54 = vpop.permute.xlu0 %1197  ;;  %v4315_v6 = vld [vmem:[#allocation77_spill] sm:$0xff] }
 0x1ba   : > { %v1233_v33 = vadd.f32 %v1220_v53, %v1119_v32  ;;  %v1112_v40 = vsel %vm562_vm13, %v3518_v36, %v3560_v26  ;;  %v736_v5 = vsel %vm417_vm11, %v4314_v20, %v4313_v10  ;;  %v1062_v23 = vadd.f32 %v1057_v35, %v1036_v61 }
 0x1bb   : > { %1754 = vrot.lane.b32.xlu0 %v4311_v60, %s2404_s28  ;;  %v1065_v30 = vadd.f32 %v1057_v35, %v1039_v0  ;;  %v1118_v14 = vadd.f32 %v3560_v26, %v1063_v47  ;;  %v1246_v43 = vpop.permute.xlu1 %1245  ;;  %v1121_v18 = vadd.f32 %v3560_v26, %v1066_v13  ;;  %v1200_v53 = vsel %vm853_vm15, %v1196_v15, %v1198_v54  ;;  %v4316_v60 = vld [vmem:[#allocation65_spill] sm:$0xff]  ;;  %v4317_v47 = vld [vmem:[#allocation14_spill] sm:$0xff] }
 0x1bc   : > { %1756 = vrot.lane.b32.xlu1 %v4312_v25, %s2404_s28  ;;  %v1256_v7 = vadd.f32 %v1246_v43, %v1230_v38  ;;  %v1259_v57 = vadd.f32 %v1246_v43, %v1233_v33  ;;  %v1117_v36 = vadd.f32 %v1112_v40, %v1062_v23  ;;  %v1206_v46 = vadd.f32 %v1200_v53, %v1177_v21  ;;  %v4319_v26 = vld [vmem:[#allocation61_spill] sm:$0xff]  ;;  %v4320_v23 = vld [vmem:[#allocation18_spill] sm:$0xff] }
 0x1bd   : > { %v1120_v44 = vadd.f32 %v1112_v40, %v1065_v30  ;;  %v1209_v32 = vadd.f32 %v1200_v53, %v1180_v17  ;;  %v623_v61 = vadd.f32 %v3398_v12, %v4316_v60  ;;  %v714_v35 = vadd.f32 %v704_v55, %v619_v1  ;;  %v1248_v17 = vpop.permute.xlu0 %1247  ;;  %v4321_v54 = vld [vmem:[#allocation54_spill] sm:$0xff]  ;;  %v4322_v12 = vld [vmem:[#allocation23_spill] sm:$0xff] }
 0x1be   : > { %v745_v0 = vadd.f32 %v736_v5, %v715_v62  ;;  %v4318_v25 = vrot.slane %v4317_v47, 2  ;;  %v3708_v15 = vmul.f32 -2.0, %v4319_v26  ;;  %v1231_v13 = vadd.f32 %v1225_v8, %v1117_v36  ;;  %v4327_v60 = vld [vmem:[#allocation78_spill] sm:$0xff]  ;;  %v4329_v47 = vld [vmem:[#allocation63_spill] sm:$0xff] }
 0x1bf   : > { %1758 = vrot.lane.b32.xlu0 %v4315_v6, %s2404_s28  ;;  %v1234_v38 = vadd.f32 %v1225_v8, %v1120_v44  ;;  %v1232_v33 = vadd.f32 %v1226_v34, %v1118_v14  ;;  %v1235_v21 = vadd.f32 %v1226_v34, %v1121_v18  ;;  %v1250_v40 = vpop.permute.xlu1 %1249  ;;  %v716_v30 = vadd.f32 %v4301_v52, %v4320_v23  ;;  %v4323_v8 = vld [vmem:[#allocation76_spill] sm:$0xff]  ;;  %v4325_v14 = vld [vmem:[#allocation17_spill] sm:$0xff] }
 0x1c0   : > { %1846 = vrot.lane.b32.xlu1 %v4318_v25, %s2402_s26  ;;  %v706_v62 = vsel %vm663_vm14, %v4322_v12, %v4321_v54  ;;  %v1251_v1 = vsel %vm926_vm12, %v1246_v43, %v1248_v17  ;;  %v1252_v55 = vsel %vm926_vm12, %v1248_v17, %v1250_v40  ;;  %v4324_v34 = vrot.slane %v4323_v8, 2  ;;  %v4326_v18 = vld [vmem:[#allocation40_spill] sm:$0xff]  ;;  %v4331_v40 = vld [vmem:[#allocation38_spill] sm:$0xff] }
 0x1c1   : > { %v1257_v5 = vadd.f32 %v1251_v1, %v1231_v13  ;;  %v1260_v53 = vadd.f32 %v1251_v1, %v1234_v38  ;;  %v1258_v6 = vadd.f32 %v1252_v55, %v1232_v33  ;;  %v1261_v36 = vadd.f32 %v1252_v55, %v1235_v21  ;;  %v4330_v13 = vld [vmem:[#allocation71_spill] sm:$0xff]  ;;  %v1275_v12 = vpop.permute.xlu0 %1274 }
 0x1c2   : > { %v719_v44 = vadd.f32 %v4326_v18, %v4325_v14  ;;  %v707_v52 = vsel %vm663_vm14, %v4321_v54, %v4326_v18  ;;  %v4328_v43 = vrot.slane %v4327_v60, 2  ;;  %v3729_v25 = vmul.f32 -2.0, %v4329_v47  ;;  %v4332_v18 = vld [vmem:[#allocation72_spill] sm:$0xff] }
 0x1c3   : > { %1848 = vrot.lane.b32.xlu0 %v4324_v34, %s2402_s26  ;;  %v3732_v38 = vmul.f32 -2.0, %v4330_v13  ;;  %v717_v33 = vadd.f32 %v706_v62, %v3659_v45  ;;  %v744_v21 = vadd.f32 %v4314_v20, %v714_v35  ;;  %v746_v17 = vadd.f32 %v4313_v10, %v716_v30  ;;  %v1277_v54 = vpop.permute.xlu1 %1276  ;;  %v4334_v10 = vld [vmem:[#allocation79_spill] sm:$0xff] }
 0x1c4   : > { %1850 = vrot.lane.b32.xlu1 %v4328_v43, %s2402_s26  ;;  %v809_v23 = vadd.f32 %v4331_v40, %v745_v0  ;;  %v1291_v1 = vadd.f32 %v1275_v12, %v1256_v7  ;;  %v1294_v55 = vadd.f32 %v1275_v12, %v1259_v57  ;;  %v3738_v8 = vadd.f32 %v1275_v12, %v1204_v37  ;;  %v4333_v43 = vld [vmem:[#allocation73_spill] sm:$0xff]  ;;  %v4335_v57 = vld [vmem:[#allocation80_spill] sm:$0xff] }
 0x1c5   : > { %v3740_v34 = vadd.f32 %v1275_v12, %v1207_v56  ;;  %v718_v14 = vadd.f32 %v707_v52, %v623_v61  ;;  %v747_v60 = vadd.f32 %v4332_v18, %v717_v33  ;;  %v737_v45 = vsel %vm417_vm11, %v4332_v18, %v4333_v43  ;;  %v4336_v61 = vld [vmem:[#allocation25_spill] sm:$0xff]  ;;  %v1279_v62 = vpop.permute.xlu0 %1278 }
 0x1c6   : > { %v1280_v20 = vsel %vm982_vm1, %v1275_v12, %v1277_v54  ;;  %v808_v0 = vadd.f32 %v4336_v61, %v744_v21  ;;  %v810_v30 = vadd.f32 %v3508_v22, %v746_v17  ;;  %v4337_v52 = vld [vmem:[#allocation81_spill] sm:$0xff]  ;;  %v1888_v40 = vrot.slane %v3629_v39, 2  ;;  %v4339_v17 = vld [vmem:[#allocation26_spill] sm:$0xff] }
 0x1c7   : > { %1852 = vrot.lane.b32.xlu0 %v4334_v10, %s2402_s26  ;;  %v3750_v35 = vadd.f32 %v1280_v20, %v3682_v4  ;;  %v3753_v37 = vadd.f32 %v1280_v20, %v3684_v41  ;;  %v1292_v56 = vadd.f32 %v1280_v20, %v1257_v5  ;;  %v3755_v7 = vadd.f32 %v1280_v20, %v1260_v53  ;;  %v1377_v53 = vpop.permute.xlu1 %1376  ;;  %v4338_v10 = vld [vmem:[#allocation37_spill] sm:$0xff]  ;;  %v4340_v39 = vld [vmem:[#allocation22_spill] sm:$0xff] }
 0x1c8   : > { %1854 = vrot.lane.b32.xlu1 %v4335_v57, %s2402_s26  ;;  %v1887_v33 = vrot.slane %v4337_v52, 2  ;;  %v905_v4 = vadd.f32 %v3456_v27, %v809_v23  ;;  %v748_v12 = vadd.f32 %v737_v45, %v718_v14  ;;  %v749_v41 = vadd.f32 %v4333_v43, %v719_v44  ;;  %v4342_v14 = vld [vmem:[#allocation47_spill] sm:$0xff] }
 0x1c9   : > { %v1281_v5 = vsel %vm982_vm1, %v1277_v54, %v1279_v62  ;;  %v811_v57 = vadd.f32 %v4339_v17, %v747_v60  ;;  %v4341_v27 = vrot.slane %v4340_v39, 2  ;;  %v1889_v44 = vrot.slane %v3708_v15, 2  ;;  %v4343_v43 = vld [vmem:[#allocation51_spill] sm:$0xff]  ;;  %v4344_v60 = vld [vmem:[#allocation33_spill] sm:$0xff]  ;;  %v4345_v15 = vld [vmem:[#allocation48_spill] sm:$0xff] }
 0x1ca   : > { %v1293_v18 = vadd.f32 %v1281_v5, %v1258_v6  ;;  %v1296_v20 = vadd.f32 %v1281_v5, %v1261_v36  ;;  %v3768_v21 = vadd.f32 %v1281_v5, %v1206_v46  ;;  %v3770_v22 = vadd.f32 %v1281_v5, %v1209_v32  ;;  %v1379_v46 = vpop.permute.xlu0 %1378 }
 0x1cb   : > { %1856 = vrot.lane.b32.xlu0 %v4338_v10, %s2402_s26  ;;  %v1891_v23 = vrot.slane %v3729_v25, 2  ;;  %v1893_v6 = vrot.slane %v3732_v38, 2  ;;  %v904_v36 = vadd.f32 %v4259_v48, %v808_v0  ;;  %v906_v54 = vadd.f32 %v3461_v63, %v810_v30  ;;  %v1381_v25 = vpop.permute.xlu1 %1380 }
 0x1cc   : > { %1895 = vrot.lane.b32.xlu1 %v4341_v27, %s2402_s26  ;;  %v1343_v32 = vadd.f32 %v4342_v14, %v1291_v1  ;;  %v1345_v45 = vadd.f32 %v4343_v43, %v1293_v18  ;;  %v812_v61 = vadd.f32 %v4344_v60, %v748_v12  ;;  %v813_v62 = vadd.f32 %v3526_v58, %v749_v41  ;;  %v4347_v12 = vld [vmem:[#allocation8_spill] sm:$0xff]  ;;  %v4349_v18 = vld [vmem:[#allocation6_spill] sm:$0xff] }
 0x1cd   : > { %v1388_v52 = vsel %vm470_vm7, %v1377_v53, %v1379_v46  ;;  %v1344_v5 = vadd.f32 %v4345_v15, %v1292_v56  ;;  %v944_v38 = vadd.f32 %v4293_v51, %v905_v4  ;;  %v1389_v48 = vsel %vm470_vm7, %v1379_v46, %v1381_v25  ;;  %v4348_v56 = vld [vmem:[#allocation60_spill] sm:$0xff] }
 0x1ce   : > { %v1398_v10 = vadd.f32 %v1388_v52, %v1343_v32  ;;  %v1400_v63 = vadd.f32 %v1381_v25, %v1345_v45  ;;  %v907_v1 = vadd.f32 %v4264_v9, %v811_v57  ;;  %v4346_v58 = vmov %v4341_v27  ;;  %v1383_v4 = vpop.permute.xlu0 %1382  ;;  %v4350_v9 = vld [vmem:[#allocation7_spill] sm:$0xff] }
 0x1cf   : > { %1897 = vrot.lane.b32.xlu0 %v1887_v33, %s2402_s26  ;;  %v1399_v0 = vadd.f32 %v1389_v48, %v1344_v5  ;;  %v1890_v30 = vsel %vm1321_vm10, %v4346_v58, %v1889_v44  ;;  %v3797_v41 = vmul.f32 %v4348_v56, %v4347_v12  ;;  %v943_v51 = vadd.f32 %v4288_v50, %v904_v36  ;;  %v4351_v44 = vld [vmem:[#allocation52_spill] sm:$0xff]  ;;  %v1385_v32 = vpop.permute.xlu1 %1384 }
 0x1d0   : > { %1899 = vrot.lane.b32.xlu1 %v1888_v40, %s2402_s26  ;;  %v1892_v53 = vsel %vm1321_vm10, %v1887_v33, %v1891_v23  ;;  %v3803_v17 = vmul.f32 %v4349_v18, %v3132_v49  ;;  %v3807_v57 = vmul.f32 %v4350_v9, %v4319_v26  ;;  %v909_v39 = vadd.f32 %v3612_v3, %v813_v62 }
 0x1d1   : > { %v945_v27 = vadd.f32 %v4294_v24, %v906_v54  ;;  %v1346_v46 = vadd.f32 %v4351_v44, %v1294_v55  ;;  %v1894_v50 = vsel %vm1321_vm10, %v1888_v40, %v1893_v6  ;;  %v908_v36 = vadd.f32 %v3474_v31, %v812_v61  ;;  %v4352_v55 = vld [vmem:[#allocation56_spill] sm:$0xff]  ;;  %v4353_v31 = vld [vmem:[#allocation53_spill] sm:$0xff] }
 0x1d2   : > { %v1006_v33 = vadd.f32 %v3514_v28, %v944_v38  ;;  %v1005_v49 = vadd.f32 %v3237_v59, %v943_v51  ;;  %v1390_v23 = vsel %vm470_vm7, %v1383_v4, %v1385_v32  ;;  %v946_v3 = vadd.f32 %v4290_v16, %v907_v1  ;;  %v1387_v40 = vpop.permute.xlu0 %1386  ;;  %v4354_v28 = vld [vmem:[#allocation75_spill] sm:$0xff] }
 0x1d3   : > { %1901 = vrot.lane.b32.xlu0 %v1890_v30, %s2402_s26  ;;  %v1007_v26 = vadd.f32 %v3557_v19, %v945_v27  ;;  %v1401_v24 = vadd.f32 %v1390_v23, %v1346_v46  ;;  %v1348_v54 = vadd.f32 %v4352_v55, %v1296_v20  ;;  %v1347_v6 = vadd.f32 %v4353_v31, %v3755_v7  ;;  %v1481_v61 = vpop.permute.xlu1 %1480 }
 0x1d4   : > { %1903 = vrot.lane.b32.xlu1 %v1892_v53, %s2402_s26  ;;  %v1935_v45 = vrot.slane %v4354_v28, 2  ;;  %v3827_v59 = vmul.f32 %v4329_v47, %v4347_v12  ;;  %v1391_v60 = vsel %vm470_vm7, %v1385_v32, %v1387_v40  ;;  %v1936_v16 = vrot.slane %v3797_v41, 2  ;;  %v4355_v53 = vld [vmem:[#allocation15_spill] sm:$0xff] }
 0x1d5   : > { %v1403_v19 = vadd.f32 %v1387_v40, %v1348_v54  ;;  %v1937_v62 = vrot.slane %v3803_v17, 2  ;;  %v947_v20 = vadd.f32 %v4297_v42, %v908_v36  ;;  %v1349_v5 = vadd.f32 %v4342_v14, %v1005_v49 }
 0x1d6   : > { %v1402_v38 = vadd.f32 %v1391_v60, %v1347_v6  ;;  %v1938_v7 = vrot.slane %v3807_v57, 2  ;;  %v948_v47 = vadd.f32 %v3619_v29, %v909_v39  ;;  %v1350_v1 = vadd.f32 %v4345_v15, %v1006_v33  ;;  %v1483_v56 = vpop.permute.xlu0 %1482 }
 0x1d7   : > { %1905 = vrot.lane.b32.xlu0 %v1894_v50, %s2402_s26  ;;  %v1351_v58 = vadd.f32 %v4343_v43, %v1007_v26  ;;  %v1008_v30 = vadd.f32 %v3269_v11, %v946_v3  ;;  %v1009_v12 = vadd.f32 %v3531_v2, %v947_v20  ;;  %v1404_v42 = vadd.f32 %v1388_v52, %v1349_v5  ;;  %v1485_v46 = vpop.permute.xlu1 %1484 }
 0x1d8   : > { %1944 = vrot.lane.b32.xlu1 %v1935_v45, %s2407_s5  ;;  %v1940_v51 = vrot.slane %v3827_v59, 2  ;;  %v1928_v4 = vmul.f32 %v4349_v18, %v4330_v13  ;;  %v1010_v9 = vadd.f32 %v4355_v53, %v948_v47  ;;  %v1405_v29 = vadd.f32 %v1389_v48, %v1350_v1 }
 0x1d9   : > { %v1406_v39 = vadd.f32 %v1381_v25, %v1351_v58  ;;  %v1492_v27 = vsel %vm562_vm13, %v1481_v61, %v1483_v56  ;;  %v1493_v2 = vsel %vm562_vm13, %v1483_v56, %v1485_v46  ;;  %v3852_v52 = vadd.f32 %v1485_v46, %v1400_v63 }
 0x1da   : > { %v3847_v32 = vadd.f32 %v1492_v27, %v1398_v10  ;;  %v3849_v11 = vadd.f32 %v1492_v27, %v1404_v42  ;;  %v1352_v50 = vadd.f32 %v4351_v44, %v1008_v30  ;;  %v3856_v13 = vadd.f32 %v1493_v2, %v1399_v0  ;;  %v1487_v10 = vpop.permute.xlu0 %1486 }
 0x1db   : > { %1946 = vrot.lane.b32.xlu0 %v1936_v16, %s2407_s5  ;;  %v3858_v18 = vadd.f32 %v1493_v2, %v1405_v29  ;;  %v3860_v25 = vadd.f32 %v1485_v46, %v1406_v39  ;;  %v1978_v48 = vmul.f32 -1.0, %v4354_v28  ;;  %v1354_v33 = vadd.f32 %v4352_v55, %v1010_v9  ;;  %v1489_v63 = vpop.permute.xlu1 %1488 }
 0x1dc   : > { %1948 = vrot.lane.b32.xlu1 %v1937_v62, %s2407_s5  ;;  %v1407_v36 = vadd.f32 %v1390_v23, %v1352_v50  ;;  %v1939_v49 = vsel %vm1321_vm10, %v1935_v45, %v1938_v7  ;;  %v1942_v26 = vrot.slane %v1928_v4, 2  ;;  %v1353_v3 = vadd.f32 %v4353_v31, %v1009_v12 }
 0x1dd   : > { %v1494_v0 = vsel %vm562_vm13, %v1487_v10, %v1489_v63  ;;  %v1941_v54 = vsel %vm1321_vm10, %v1936_v16, %v1940_v51  ;;  %v1409_v6 = vadd.f32 %v1387_v40, %v1354_v33  ;;  %v1979_v23 = vmul.f32 -1.0, %v3797_v41 }
 0x1de   : > { %v3870_v61 = vadd.f32 %v1494_v0, %v1401_v24  ;;  %v3872_v20 = vadd.f32 %v1494_v0, %v1407_v36  ;;  %v1408_v28 = vadd.f32 %v1391_v60, %v1353_v3  ;;  %v1491_v45 = vpop.permute.xlu0 %1490  ;;  %v1990_v5 = vrot.slane %v1978_v48, 2 }
 0x1df   : > { %1950 = vrot.lane.b32.xlu0 %v1939_v49, %s2407_s5  ;;  %v1980_v7 = vmul.f32 -1.0, %v3803_v17  ;;  %v1981_v47 = vmul.f32 -1.0, %v3807_v57  ;;  %v1495_v1 = vsel %vm562_vm13, %v1489_v63, %v1491_v45  ;;  %v3879_v58 = vadd.f32 %v1491_v45, %v1403_v19  ;;  %v1432_v24 = vpop.permute.xlu1 %1431 }
 0x1e0   : > { %1952 = vrot.lane.b32.xlu1 %v1941_v54, %s2407_s5  ;;  %v1513_v40 = vadd.f32 %v1491_v45, %v1409_v6  ;;  %v1943_v16 = vsel %vm1321_vm10, %v1937_v62, %v1942_v26  ;;  %v3882_v30 = vadd.f32 %v1495_v1, %v1402_v38  ;;  %v1512_v12 = vadd.f32 %v1495_v1, %v1408_v28 }
 0x1e1   : > { %v1982_v41 = vmul.f32 -1.0, %v3827_v59  ;;  %v1337_v57 = vadd.f32 %v4342_v14, %v3738_v8  ;;  %v1339_v60 = vadd.f32 %v4343_v43, %v3768_v21  ;;  %v1991_v19 = vrot.slane %v1979_v23, 2 }
 0x1e2   : > { %v1434_v17 = vpop.permute.xlu0 %1433  ;;  %v1992_v42 = vrot.slane %v1980_v7, 2  ;;  %v1338_v38 = vadd.f32 %v4345_v15, %v3750_v35  ;;  %v1993_v51 = vrot.slane %v1981_v47, 2  ;;  %v1983_v53 = vmul.f32 -1.0, %v1928_v4 }
 0x1e3   : > { %1954 = vrot.lane.b32.xlu0 %v1943_v16, %s2407_s5  ;;  %v1443_v62 = vsel %vm562_vm13, %v1432_v24, %v1434_v17  ;;  %v1436_v56 = vpop.permute.xlu1 %1435  ;;  %v1995_v8 = vrot.slane %v1982_v41, 2  ;;  %v1340_v43 = vadd.f32 %v4351_v44, %v3740_v34  ;;  %v1342_v2 = vadd.f32 %v4352_v55, %v3770_v22 }
 0x1e4   : > { %1999 = vrot.lane.b32.xlu1 %v1990_v5, %s2407_s5  ;;  %v1453_v59 = vadd.f32 %v1443_v62, %v1337_v57  ;;  %v1444_v9 = vsel %vm562_vm13, %v1434_v17, %v1436_v56  ;;  %v1455_v29 = vadd.f32 %v1436_v56, %v1339_v60  ;;  %v1994_v35 = vsel %vm1321_vm10, %v1990_v5, %v1993_v51 }
 0x1e5   : > { %v1454_v14 = vadd.f32 %v1444_v9, %v1338_v38  ;;  %v1997_v15 = vrot.slane %v1983_v53, 2  ;;  %v1996_v27 = vsel %vm1321_vm10, %v1991_v19, %v1995_v8  ;;  %v1341_v34 = vadd.f32 %v4353_v31, %v3753_v37 }
 0x1e6   : > { %v1438_v21 = vpop.permute.xlu0 %1437 }
 0x1e7   : > { %2001 = vrot.lane.b32.xlu0 %v1991_v19, %s2407_s5  ;;  %v1440_v39 = vpop.permute.xlu1 %1439  ;;  %v1998_v36 = vsel %vm1321_vm10, %v1992_v42, %v1997_v15 }
 0x1e8   : > { %2003 = vrot.lane.b32.xlu1 %v1992_v42, %s2407_s5  ;;  %v1445_v4 = vsel %vm562_vm13, %v1438_v21, %v1440_v39 }
 0x1e9   : > { %v1456_v46 = vadd.f32 %v1445_v4, %v1340_v43 }
 0x1ea   : > { %v1442_v50 = vpop.permute.xlu0 %1441 }
 0x1eb   : > { %2005 = vrot.lane.b32.xlu0 %v1994_v35, %s2407_s5  ;;  %v1446_v44 = vsel %vm562_vm13, %v1440_v39, %v1442_v50  ;;  %v1458_v10 = vadd.f32 %v1442_v50, %v1342_v2  ;;  %v1542_v48 = vpop.permute.xlu1 %1541 }
 0x1ec   : > { %2007 = vrot.lane.b32.xlu1 %v1996_v27, %s2407_s5  ;;  %v1457_v33 = vadd.f32 %v1446_v44, %v1341_v34 }
 0x1ee   : > { %v1544_v63 = vpop.permute.xlu0 %1543 }
 0x1ef   : > { %2009 = vrot.lane.b32.xlu0 %v1998_v36, %s2407_s5  ;;  %v1553_v49 = vsel %vm663_vm14, %v1542_v48, %v1544_v63  ;;  %v1546_v26 = vpop.permute.xlu1 %1545 }
 0x1f0   : > { %v1563_v3 = vadd.f32 %v1553_v49, %v1453_v59  ;;  %v1569_v22 = vadd.f32 %v1553_v49, %v3849_v11  ;;  %v1554_v55 = vsel %vm663_vm14, %v1544_v63, %v1546_v26  ;;  %v1565_v0 = vadd.f32 %v1546_v26, %v1455_v29 }
 0x1f1   : > { %v1564_v37 = vadd.f32 %v1554_v55, %v1454_v14  ;;  %v1570_v31 = vadd.f32 %v1554_v55, %v3858_v18  ;;  %v1571_v54 = vadd.f32 %v1546_v26, %v3860_v25 }
 0x1f2   : > { %v1548_v6 = vpop.permute.xlu0 %1547 }
 0x1f3   : > { %v1550_v23 = vpop.permute.xlu1 %1549 }
 0x1f4   : > { %v1555_v28 = vsel %vm663_vm14, %v1548_v6, %v1550_v23 }
 0x1f5   : > { %v1566_v45 = vadd.f32 %v1555_v28, %v1456_v46  ;;  %v1572_v5 = vadd.f32 %v1555_v28, %v3872_v20 }
 0x1f6   : > { %v1552_v7 = vpop.permute.xlu0 %1551 }
 0x1f7   : > { %v1556_v47 = vsel %vm663_vm14, %v1550_v23, %v1552_v7  ;;  %v1568_v1 = vadd.f32 %v1552_v7, %v1458_v10  ;;  %v1574_v11 = vadd.f32 %v1552_v7, %v1513_v40  ;;  %v1590_v24 = vpop.permute.xlu1 %1589 }
 0x1f8   : > { %v1567_v16 = vadd.f32 %v1556_v47, %v1457_v33  ;;  %v1573_v41 = vadd.f32 %v1556_v47, %v1512_v12  ;;  %v1605_v17 = vadd.f32 %v1590_v24, %v1569_v22 }
 0x1fa   : > { %v1592_v57 = vpop.permute.xlu0 %1591 }
 0x1fb   : > { %v1597_v18 = vsel %vm417_vm11, %v1590_v24, %v1592_v57  ;;  %v1607_v25 = vadd.f32 %v1592_v57, %v1571_v54  ;;  %v1594_v60 = vpop.permute.xlu1 %1593 }
 0x1fc   : > { %v1606_v19 = vadd.f32 %v1597_v18, %v1570_v31  ;;  %v1608_v42 = vadd.f32 %v1594_v60, %v1572_v5 }
 0x1fe   : > { %v1596_v62 = vpop.permute.xlu0 %1595 }
 0x1ff   : > { %v1598_v38 = vsel %vm417_vm11, %v1594_v60, %v1596_v62  ;;  %v1610_v20 = vadd.f32 %v1596_v62, %v1574_v11  ;;  %v1645_v56 = vpop.permute.xlu1 %1644 }
 0x200   : > { %v1609_v51 = vadd.f32 %v1598_v38, %v1573_v41  ;;  %v1666_v53 = vadd.f32 %v1645_v56, %v1563_v3 }
 0x202   : > { %v1647_v59 = vpop.permute.xlu0 %1646 }
 0x203   : > { %v1656_v40 = vsel %vm791_vm0, %v1645_v56, %v1647_v59  ;;  %v1649_v9 = vpop.permute.xlu1 %1648 }
 0x204   : > { %v3922_v12 = vadd.f32 %v1656_v40, %v1564_v37  ;;  %v1657_v29 = vsel %vm791_vm0, %v1647_v59, %v1649_v9 }
 0x205   : > { %v3925_v8 = vadd.f32 %v1657_v29, %v1565_v0 }
 0x206   : > { %v1651_v14 = vpop.permute.xlu0 %1650 }
 0x207   : > { %v3927_v21 = vadd.f32 %v1651_v14, %v1566_v45  ;;  %v1653_v43 = vpop.permute.xlu1 %1652 }
 0x208   : > { %v1658_v39 = vsel %vm791_vm0, %v1651_v14, %v1653_v43 }
 0x209   : > { %v3930_v35 = vadd.f32 %v1658_v39, %v1567_v16 }
 0x20a   : > { %v1655_v15 = vpop.permute.xlu0 %1654 }
 0x20b   : > { %v1659_v4 = vsel %vm791_vm0, %v1653_v43, %v1655_v15  ;;  %v1694_v27 = vpop.permute.xlu1 %1693 }
 0x20c   : > { %v3933_v46 = vadd.f32 %v1659_v4, %v1568_v1  ;;  %v1715_v2 = vadd.f32 %v1694_v27, %v1605_v17 }
 0x20e   : > { %v1696_v50 = vpop.permute.xlu0 %1695 }
 0x20f   : > { %v1705_v34 = vsel %vm791_vm0, %v1694_v27, %v1696_v50  ;;  %v1698_v44 = vpop.permute.xlu1 %1697 }
 0x210   : > { %v1716_v10 = vadd.f32 %v1705_v34, %v1606_v19  ;;  %v1706_v48 = vsel %vm791_vm0, %v1696_v50, %v1698_v44 }
 0x211   : > { %v3937_v36 = vadd.f32 %v1706_v48, %v1607_v25 }
 0x212   : > { %v1700_v33 = vpop.permute.xlu0 %1699 }
 0x213   : > { %v3939_v63 = vadd.f32 %v1700_v33, %v1608_v42  ;;  %v1702_v49 = vpop.permute.xlu1 %1701 }
 0x214   : > { %v1707_v26 = vsel %vm791_vm0, %v1700_v33, %v1702_v49 }
 0x215   : > { %v3942_v3 = vadd.f32 %v1707_v26, %v1609_v51 }
 0x216   : > { %v1704_v22 = vpop.permute.xlu0 %1703 }
 0x217   : > { %v1708_v55 = vsel %vm791_vm0, %v1702_v49, %v1704_v22 }
 0x218   : > { %v3945_v37 = vadd.f32 %v1708_v55, %v1610_v20 }
 0x219   : > { %v1792_v0 = vpop.permute.xlu1 %1791 }
 0x21a   : > { %v1813_v20 = vadd.f32 %v1792_v0, %v3847_v32 }
 0x21c   : > { %v1794_v31 = vpop.permute.xlu0 %1793 }
 0x21d   : > { %v1796_v54 = vpop.permute.xlu1 %1795  ;;  %v1803_v42 = vsel %vm853_vm15, %v1792_v0, %v1794_v31 }
 0x21e   : > { %v1804_v56 = vsel %vm853_vm15, %v1794_v31, %v1796_v54  ;;  %v1814_v59 = vadd.f32 %v1803_v42, %v3856_v13 }
 0x21f   : > { %v1815_v15 = vadd.f32 %v1804_v56, %v3852_v52 }
 0x220   : > { %v1798_v6 = vpop.permute.xlu0 %1797 }
 0x221   : > { %v1800_v23 = vpop.permute.xlu1 %1799  ;;  %v1816_v32 = vadd.f32 %v1798_v6, %v3870_v61 }
 0x222   : > { %v1805_v51 = vsel %vm853_vm15, %v1798_v6, %v1800_v23 }
 0x223   : > { %v1817_v4 = vadd.f32 %v1805_v51, %v3882_v30 }
 0x224   : > { %v1802_v28 = vpop.permute.xlu0 %1801 }
 0x225   : > { %v1749_v45 = vpop.permute.xlu1 %1748  ;;  %v1806_v40 = vsel %vm853_vm15, %v1800_v23, %v1802_v28 }
 0x226   : > { %v1770_v9 = vadd.f32 %v1749_v45, %v1666_v53  ;;  %v1818_v50 = vadd.f32 %v1806_v40, %v3879_v58  ;;  %v1819_v48 = vadd.f32 %v1749_v45, %v1715_v2 }
 0x229   : > { %v1751_v5 = vpop.permute.xlu0 %1750 }
 0x22a   : > { %v1753_v7 = vpop.permute.xlu1 %1752  ;;  %v1760_v29 = vsel %vm853_vm15, %v1749_v45, %v1751_v5 }
 0x22b   : > { %v3967_v14 = vsel %vm853_vm15, %v1751_v5, %v1753_v7  ;;  %v1771_v33 = vadd.f32 %v1760_v29, %v3922_v12  ;;  %v1820_v49 = vadd.f32 %v1760_v29, %v1716_v10 }
 0x22c   : > { %v1772_v52 = vadd.f32 %v3967_v14, %v3925_v8 }
 0x22d   : > { %v3947_v47 = vpop.permute.xlu0 %1754 }
 0x22e   : > { %v1757_v1 = vpop.permute.xlu1 %1756  ;;  %v1773_v61 = vadd.f32 %v3947_v47, %v3927_v21 }
 0x22f   : > { %v1762_v58 = vsel %vm853_vm15, %v3947_v47, %v1757_v1 }
 0x230   : > { %v1774_v5 = vadd.f32 %v1762_v58, %v3930_v35 }
 0x231   : > { %v1759_v11 = vpop.permute.xlu0 %1758 }
 0x232   : > { %v1847_v24 = vpop.permute.xlu1 %1846  ;;  %v3985_v0 = vsel %vm853_vm15, %v1757_v1, %v1759_v11 }
 0x233   : > { %v1868_v43 = vadd.f32 %v1847_v24, %v1813_v20  ;;  %v1775_v51 = vadd.f32 %v3985_v0, %v3933_v46 }
 0x235   : > { %v1849_v16 = vpop.permute.xlu0 %1848 }
 0x236   : > { %v1851_v41 = vpop.permute.xlu1 %1850  ;;  %v1858_v27 = vsel %vm926_vm12, %v1847_v24, %v1849_v16 }
 0x237   : > { %v1859_v53 = vsel %vm926_vm12, %v1849_v16, %v1851_v41  ;;  %v1869_v30 = vadd.f32 %v1858_v27, %v1814_v59 }
 0x238   : > { %v1870_v2 = vadd.f32 %v1859_v53, %v1815_v15 }
 0x239   : > { %v1853_v17 = vpop.permute.xlu0 %1852 }
 0x23a   : > { %v1855_v57 = vpop.permute.xlu1 %1854  ;;  %v1871_v21 = vadd.f32 %v1853_v17, %v1816_v32 }
 0x23b   : > { %v1860_v23 = vsel %vm926_vm12, %v1853_v17, %v1855_v57 }
 0x23c   : > { %v1872_v59 = vadd.f32 %v1860_v23, %v1817_v4 }
 0x23d   : > { %v1857_v18 = vpop.permute.xlu0 %1856 }
 0x23e   : > { %v3949_v25 = vpop.permute.xlu1 %1895  ;;  %v1861_v7 = vsel %vm926_vm12, %v1855_v57, %v1857_v18 }
 0x23f   : > { %v1873_v57 = vadd.f32 %v1861_v7, %v1818_v50  ;;  %v1917_v18 = vadd.f32 %v3949_v25, %v1819_v48  ;;  %v1821_v48 = vadd.f32 %v3967_v14, %v3937_v36 }
 0x241   : > { %v3951_v60 = vpop.permute.xlu0 %1897 }
 0x242   : > { %v3953_v19 = vpop.permute.xlu1 %1899  ;;  %v1907_v15 = vsel %vm926_vm12, %v3949_v25, %v3951_v60 }
 0x243   : > { %v1908_v46 = vsel %vm926_vm12, %v3951_v60, %v3953_v19  ;;  %v1822_v60 = vadd.f32 %v3947_v47, %v3939_v63 }
 0x244   : > { %v1919_v19 = vadd.f32 %v1908_v46, %v1821_v48 }
 0x245   : > { %v3956_v62 = vpop.permute.xlu0 %1901 }
 0x246   : > { %v3958_v38 = vpop.permute.xlu1 %1903 }
 0x249   : > { %v3969_v39 = vpop.permute.xlu0 %1905 }
 0x24a   : > { %v1945_v13 = vpop.permute.xlu1 %1944 }
 0x24b   : > { %v1966_v34 = vadd.f32 %v1945_v13, %v1770_v9  ;;  %v1972_v44 = vadd.f32 %v1945_v13, %v1868_v43 }
 0x24d   : > { %v2027_v26 = vand.u32 2147483647, %v1966_v34  ;;  %v2033_v22 = vand.u32 2147483647, %v1972_v44  ;;  %v1947_v55 = vpop.permute.xlu0 %1946 }
 0x24e   : > { %v1956_v12 = vsel %vm982_vm1, %v1945_v13, %v1947_v55  ;;  %v1949_v10 = vpop.permute.xlu1 %1948 }
 0x24f   : > { %v2039_v31 = vadd.f32 %v2033_v22, %v2027_v26  ;;  %v1967_v54 = vadd.f32 %v1956_v12, %v1771_v33  ;;  %v1973_v8 = vadd.f32 %v1956_v12, %v1869_v30  ;;  %v1957_v6 = vsel %vm982_vm1, %v1947_v55, %v1949_v10 }
 0x250   : > { %v1968_v28 = vadd.f32 %v1957_v6, %v1772_v52  ;;  %v1974_v45 = vadd.f32 %v1957_v6, %v1870_v2  ;;  %v1909_v2 = vsel %vm926_vm12, %v3956_v62, %v3958_v38  ;;  %v1920_v6 = vadd.f32 %v3956_v62, %v1822_v60 }
 0x251   : > { %v2028_v1 = vand.u32 2147483647, %v1967_v54  ;;  %v2034_v11 = vand.u32 2147483647, %v1973_v8  ;;  %v1951_v24 = vpop.permute.xlu0 %1950 }
 0x252   : > { %v2029_v16 = vand.u32 2147483647, %v1968_v28  ;;  %v2035_v41 = vand.u32 2147483647, %v1974_v45  ;;  %v1969_v42 = vadd.f32 %v1951_v24, %v1773_v61  ;;  %v1975_v20 = vadd.f32 %v1951_v24, %v1871_v21  ;;  %v1953_v56 = vpop.permute.xlu1 %1952 }
 0x253   : > { %v2040_v40 = vadd.f32 %v2034_v11, %v2028_v1  ;;  %v1958_v17 = vsel %vm982_vm1, %v1951_v24, %v1953_v56  ;;  %v1918_v61 = vadd.f32 %v1907_v15, %v1820_v49  ;;  %v1823_v49 = vadd.f32 %v1762_v58, %v3942_v3 }
 0x254   : > { %v2041_v9 = vadd.f32 %v2035_v41, %v2029_v16  ;;  %v2030_v29 = vand.u32 2147483647, %v1969_v42  ;;  %v2036_v35 = vand.u32 2147483647, %v1975_v20  ;;  %v1970_v43 = vadd.f32 %v1958_v17, %v1774_v5 }
 0x255   : > { %v1976_v32 = vadd.f32 %v1958_v17, %v1872_v59  ;;  %v1955_v27 = vpop.permute.xlu0 %1954  ;;  %v1921_v47 = vadd.f32 %v1909_v2, %v1823_v49  ;;  %v1910_v28 = vsel %vm926_vm12, %v3958_v38, %v3969_v39 }
 0x256   : > { %v2042_v4 = vadd.f32 %v2036_v35, %v2030_v29  ;;  %v2031_v13 = vand.u32 2147483647, %v1970_v43  ;;  %v1959_v53 = vsel %vm982_vm1, %v1953_v56, %v1955_v27  ;;  %v2000_v34 = vpop.permute.xlu1 %1999 }
 0x257   : > { %v2037_v44 = vand.u32 2147483647, %v1976_v32  ;;  %v1971_v33 = vadd.f32 %v1959_v53, %v1775_v51  ;;  %v1977_v50 = vadd.f32 %v1959_v53, %v1873_v57  ;;  %v2021_v52 = vadd.f32 %v2000_v34, %v1917_v18 }
 0x259   : > { %v2043_v25 = vadd.f32 %v2037_v44, %v2031_v13  ;;  %v2032_v30 = vand.u32 2147483647, %v1971_v33  ;;  %v2038_v26 = vand.u32 2147483647, %v1977_v50  ;;  %v2045_v22 = vand.u32 2147483647, %v2021_v52  ;;  %v2002_v55 = vpop.permute.xlu0 %2001 }
 0x25a   : > { %v2011_v12 = vsel %vm982_vm1, %v2000_v34, %v2002_v55  ;;  %v2004_v10 = vpop.permute.xlu1 %2003 }
 0x25b   : > { %v2044_v54 = vadd.f32 %v2038_v26, %v2032_v30  ;;  %v2051_v8 = vadd.f32 %v2045_v22, %v2039_v31  ;;  %v2022_v36 = vadd.f32 %v2011_v12, %v1918_v61  ;;  %v2012_v14 = vsel %vm982_vm1, %v2002_v55, %v2004_v10 }
 0x25c   : > { %v2023_v21 = vadd.f32 %v2012_v14, %v1919_v19  ;;  %v1824_v31 = vadd.f32 %v3985_v0, %v3945_v37 }
 0x25d   : > { %v2046_v23 = vand.u32 2147483647, %v2022_v36  ;;  %v2006_v63 = vpop.permute.xlu0 %2005  ;;  %v2064_v38 = vrot.slane %v2051_v8, 7 }
 0x25e   : > { %v2047_v45 = vand.u32 2147483647, %v2023_v21  ;;  %v2024_v5 = vadd.f32 %v2006_v63, %v1920_v6  ;;  %v2008_v7 = vpop.permute.xlu1 %2007  ;;  %v1922_v24 = vadd.f32 %v1910_v28, %v1824_v31 }
 0x25f   : > { %v2052_v1 = vadd.f32 %v2046_v23, %v2040_v40  ;;  %v2013_v11 = vsel %vm982_vm1, %v2006_v63, %v2008_v7 }
 0x260   : > { %v2053_v3 = vadd.f32 %v2047_v45, %v2041_v9  ;;  %v2048_v58 = vand.u32 2147483647, %v2024_v5  ;;  %v2025_v62 = vadd.f32 %v2013_v11, %v1921_v47 }
 0x261   : > { %v2010_v16 = vpop.permute.xlu0 %2009  ;;  %v2067_v17 = vrot.slane %v2052_v1, 7 }
 0x262   : > { %v2054_v41 = vadd.f32 %v2048_v58, %v2042_v4  ;;  %v2049_v42 = vand.u32 2147483647, %v2025_v62  ;;  %v2014_v20 = vsel %vm982_vm1, %v2008_v7, %v2010_v16  ;;  %v2070_v29 = vrot.slane %v2053_v3, 7 }
 0x263   : > { %v2026_v56 = vadd.f32 %v2014_v20, %v1922_v24 }
 0x264   : > { %v2065_v39 = vrot.slane %v2054_v41, 7  ;;  %v2055_v51 = vadd.f32 %v2049_v42, %v2043_v25 }
 0x265   : > { %v2050_v59 = vand.u32 2147483647, %v2026_v56 }
 0x266   : > { %v2068_v37 = vrot.slane %v2055_v51, 7  ;;  %v2066_v0 = vsel %vm2063_vm2, %v2064_v38, %v2065_v39 }
 0x267   : > { %v2056_v40 = vadd.f32 %v2050_v59, %v2044_v54  ;;  %2073 = vrot.lane.b32.xlu1 %v2066_v0, %s2400_s24 }
 0x268   : > { %v2069_v9 = vsel %vm2063_vm2, %v2067_v17, %v2068_v37 }
 0x269   : > { %v2071_v35 = vrot.slane %v2056_v40, 7  ;;  %2075 = vrot.lane.b32.xlu0 %v2069_v9, %s2400_s24 }
 0x26b   : > { %v2072_v43 = vsel %vm2063_vm2, %v2070_v29, %v2071_v35 }
 0x26c   : > { %2077 = vrot.lane.b32.xlu1 %v2072_v43, %s2400_s24 }
 0x2d9   : > { %v2074_v57 = vpop.permute.xlu1 %2073 }
 0x2db   : > { %v2076_v18 = vpop.permute.xlu0 %2075 }
 0x2dc   : > { %v2079_v32 = vsel %vm953_vm9, %v2074_v57, %v2076_v18 }
 0x2de   : > { %v2078_v15 = vpop.permute.xlu1 %2077 }
 0x2df   : > { %v2080_v27 = vsel %vm953_vm9, %v2076_v18, %v2078_v15 }
 0x2e0   : > { %v2083_v46 = vadd.f32 %v2080_v27, %v2079_v32 }
 0x2e2   : > { %2084 = vadd.xlane.f32.xlu0 %v2083_v46 }
 0x36f   : > { %v2085_v4 = vpop.xlane.xlu0 %2084 }
 0x370   : > { %v2086_v13 = vrot.slane %v2085_v4, 4 }
 0x372   : > { %v2087_v53 = vadd.f32 %v2086_v13, %v2085_v4 }
 0x374   : > { %v2088_v34 = vrot.slane %v2087_v53, 2 }
 0x376   : > { %v2089_v44 = vadd.f32 %v2088_v34, %v2087_v53 }
 0x378   : > { %v2090_v33 = vrot.slane %v2089_v44, 1 }
 0x37a   : > { %v2091_v50 = vadd.f32 %v2090_v33, %v2089_v44 }
 0x37c   : > { %2270 = vpush %v2091_v50 }
 0x3ad   : > { %s2271_s12 = spop %2270 }
 0x3ae   : > { %v2093_v52 = vstv %s2271_s12 }
 0x3af   : > { %2094 = vst [vmem:[%s333_s11] sm:$0xff] %v2093_v52 }
 0x3b0 PF: > { %s14_s19 = sadd.s32 1, %s2393_s19   ;;  %s4356_s15 = smov %s2385_s17 }
 0x3b1   : > { %p11_p7 = scmp.ge.s32.totalorder %s14_s19, 6   ;;  %s4357_s16 = smov %s2389_s18 }
 0x3b2   : > { %s4358_s17 = smov %s4361_s20  ;;  %s4359_s18 = smov %s4365_s21 }
 0x3b3   :  { %13 = sbr.rel (!%p11_p7) target bundleno = 3 (0x3), region = 79 }

</bundles_post_ra>
